<compile_context>
chip_gen: v6e
topology: v6e:2x2x1
jax: 0.10.0
libtpu: 0.0.40
codegen_flags: <defaults>
</compile_context>

<pallas_src>
import functools

import jax
import jax.numpy as jnp
from jax.experimental import pallas as pl
from jax.experimental.pallas import tpu as pltpu


def _round_up(x: int, m: int) -> int:
    return -(-x // m) * m


def _gelu_exact(x):
    # Exact (erf-based) GELU matching torch.nn.functional.gelu's default, via
    # the Abramowitz & Stegun 7.1.26 rational erf approximation
    # (|abs err| < 1.5e-7).  Only mul/add/div/exp/abs/where -> lowers cleanly.
    # NOTE: the divide is exact; the approx EUP reciprocal used previously was
    # the dominant source of the ~1.7e-3 mismatch.
    z = x * 0.7071067811865476
    a = jnp.abs(z)
    t = 1.0 / (1.0 + 0.3275911 * a)
    poly = t * (0.254829592
         + t * (-0.284496736
         + t * (1.421413741
         + t * (-1.453152027
         + t * 1.061405429))))
    erf_abs = 1.0 - poly * jnp.exp(-a * a)
    erf = jnp.where(z >= 0.0, erf_abs, -erf_abs)
    return 0.5 * x * (1.0 + erf)


def conv_transpose_layer_block(x, weight, bias, ln_gamma, ln_beta, *,
                               stride, padding, eps=1e-5, batch_block=None,
                               compute_dtype=jnp.float32,
                               out_dtype=jnp.float32):
    """Forward pass of voice100 ConvTransposeLayerBlock.

    x:        (N, C_in, L_in)   float32 (NCL, like PyTorch)
    weight:   (C_in, C_out, K)  nn.ConvTranspose1d weight layout
    bias:     (C_out,)          conv bias
    ln_gamma: (C_out,)          LayerNorm weight
    ln_beta:  (C_out,)          LayerNorm bias
    returns:  (N, C_out, L_out) with L_out = (L_in - 1)*stride - 2*padding + K
    """
    N, C_in, L_in = x.shape
    w_cin, C_out, K = weight.shape
    assert w_cin == C_in
    S, P = int(stride), int(padding)
    L_out = (L_in - 1) * S - 2 * P + K
    T_full = (L_in - 1) * S + K              # uncropped ConvTranspose1d length

    # Phase decomposition: output time t = q*S + r.  Phase r only sees taps
    # k = r + j*S (j = 0..Jmax-1), and tap j reads input row q - j.
    Jmax = (K + S - 1) // S                  # shifted-input terms per phase
    LEAD = Jmax - 1                          # leading zero rows (left halo)
    B = L_in + Jmax - 1                      # uncropped output rows per phase
    Bp = _round_up(B, 8)                     # sublane-aligned rows per batch
    SC = S * C_out                           # fused (phase, channel) lane width

    # Batch rows per grid step.  Keep >= 2 grid steps whenever N >= 2 so the
    # DMA pipeline overlaps and v7x can shard steps across its 2 TensorCores.
    if batch_block is None:
        nb = max(1, min(N, 256 // Bp))       # target a few hundred MXU rows
        if N >= 2:
            nb = min(nb, -(-N // 2))
        batch_block = nb
    NB = int(batch_block)
    n_steps = -(-N // NB)
    Npad = n_steps * NB
    R = NB * Bp                              # output rows per grid step
    ROWS_IN = _round_up(LEAD + R, 8)         # input rows per grid step

    # ---- input slab: channels-last, per-batch zero-padded to Bp rows, plus
    # LEAD leading zero rows per grid step, so the per-tap shifted views are
    # plain static slices inside the kernel.  (Batch boundaries are safe: the
    # >= LEAD zero tail rows of each batch absorb the shift into the next.)
    # TODO(synk): fold this NCL->NLC transpose into the kernel (dot_general
    # contracting on C_in) to drop the one remaining small wrapper pass on x.
    x_nlc = jnp.transpose(x, (0, 2, 1)).astype(compute_dtype)   # (N, L_in, C_in)
    x_nlc = jnp.pad(x_nlc, ((0, Npad - N), (0, Bp - L_in), (0, 0)))
    x_stp = x_nlc.reshape(n_steps, R, C_in)
    x_stp = jnp.pad(x_stp, ((0, 0), (LEAD, ROWS_IN - LEAD - R), (0, 0)))
    x_slab = x_stp.reshape(n_steps * ROWS_IN, C_in)

    # ---- fused weight: w_f[j, c, r*C_out + o] = W[c, o, j*S + r] (zero past K).
    # The matmul lane dim is (phase, channel), so the MXU directly emits the
    # phase-interleaved output layout — no output-side shifting/stacking.
    w_pad = jnp.zeros((C_in, C_out, Jmax * S), weight.dtype)
    w_pad = w_pad.at[:, :, :K].set(weight)
    w_f = jnp.transpose(w_pad.reshape(C_in, C_out, Jmax, S), (2, 0, 3, 1))
    w_f = w_f.reshape(Jmax, C_in, SC).astype(compute_dtype)

    # ---- block-diagonal averaging matrix for the per-time-step LayerNorm
    # reduction (keeps the epilogue lane-dense; the MXU has plenty of slack).
    grp = jnp.arange(SC) // C_out
    gn = (grp[:, None] == grp[None, :]).astype(jnp.float32) / float(C_out)

    # ---- bias / gamma / beta pre-tiled to the fused lane width (one DMA).
    params = jnp.stack([jnp.tile(bias, S), jnp.tile(ln_gamma, S),
                        jnp.tile(ln_beta, S)], axis=0).astype(jnp.float32)

    hi = jax.lax.Precision.HIGHEST

    def kernel(x_ref, w_ref, gn_ref, prm_ref, o_ref):
        # Transposed conv = sum over taps of (input shifted by j) @ W_j; the
        # shifted views are free static slices of the pre-padded input slab.
        acc = None
        for j in range(Jmax):
            xs = x_ref[LEAD - j:LEAD - j + R, :]               # (R, C_in)
            p = jnp.dot(xs, w_ref[j],
                        preferred_element_type=jnp.float32,
                        precision=hi)                          # (R, SC)
            acc = p if acc is None else acc + p
        prm = prm_ref[...]
        y = acc + prm[0:1, :]                                  # conv bias
        # LayerNorm over the C_out channels of each time step, staying in the
        # lane-dense (R, S*C_out) layout: block-diag matmul = segmented mean.
        gmat = gn_ref[...]
        mean = jnp.dot(y, gmat, preferred_element_type=jnp.float32,
                       precision=hi)
        cy = y - mean
        var = jnp.dot(cy * cy, gmat, preferred_element_type=jnp.float32,
                      precision=hi)                            # two-pass var
        yn = cy * jax.lax.rsqrt(var + eps)
        yn = yn * prm[1:2, :] + prm[2:3, :]
        o_ref[...] = _gelu_exact(yn).astype(o_ref.dtype)       # single store

    out = pl.pallas_call(
        kernel,
        out_shape=jax.ShapeDtypeStruct((Npad * Bp, SC), out_dtype),
        grid_spec=pltpu.PrefetchScalarGridSpec(
            num_scalar_prefetch=0,
            grid=(n_steps,),
            in_specs=[
                pl.BlockSpec((ROWS_IN, C_in), lambda n: (n, 0)),
                pl.BlockSpec((Jmax, C_in, SC), lambda n: (0, 0, 0)),
                pl.BlockSpec((SC, SC), lambda n: (0, 0)),
                pl.BlockSpec((3, SC), lambda n: (0, 0)),
            ],
            out_specs=pl.BlockSpec((R, SC), lambda n: (n, 0)),
        ),
        compiler_params=pltpu.CompilerParams(
            dimension_semantics=("parallel",),
            vmem_limit_bytes=32 * 1024 * 1024),
        # TODO(synk): for very long L_in, add a second (time) grid axis with a
        # Jmax-1-row halo on the input slab so a single batch row also tiles.
    )(x_slab, w_f, gn, params)

    # out[n*Bp + q, r*C_out + o] == uncropped y[n, q*S + r, o]; this reshape
    # is free (contiguous) — only crop + final NCL transpose remain.
    y_full = out.reshape(Npad, Bp * S, C_out)
    y = y_full[:N, P:P + L_out, :]
    return jnp.transpose(y, (0, 2, 1))                         # (N, C_out, L_out)


def _reference(x, weight, bias, ln_gamma, ln_beta, stride, padding, eps=1e-5):
    """Pure-JAX reference matching PyTorch semantics (for sanity check)."""
    N, C_in, L_in = x.shape
    _, C_out, K = weight.shape
    L_out = (L_in - 1) * stride - 2 * padding + K
    T_full = (L_in - 1) * stride + K
    p = jnp.einsum('ncl,cok->nlko', x, weight,
                   precision=jax.lax.Precision.HIGHEST)        # (N, L_in, K, C_out)
    y_full = jnp.zeros((N, T_full, C_out), jnp.float32)
    for k in range(K):
        idx = jnp.arange(L_in) * stride + k
        y_full = y_full.at[:, idx, :].add(p[:, :, k, :])
    y = y_full[:, padding:padding + L_out, :] + bias[None, None, :]
    mean = jnp.mean(y, axis=-1, keepdims=True)
    var = jnp.mean((y - mean) ** 2, axis=-1, keepdims=True)
    yn = (y - mean) / jnp.sqrt(var + eps)
    yn = yn * ln_gamma + ln_beta
    out = jax.nn.gelu(yn, approximate=False)
    return jnp.transpose(out, (0, 2, 1))


if __name__ == "__main__":
    # ConvTransposeLayerBlock(in_channels=16, out_channels=32, kernel_size=5,
    #                         stride=2, padding=2, bias=True)
    N, C_in, C_out, L_in = 2, 16, 32, 16
    K, S, P = 5, 2, 2

    key = jax.random.PRNGKey(0)
    kx, kw, kb, kg, kbt = jax.random.split(key, 5)
    x = jax.random.normal(kx, (N, C_in, L_in), jnp.float32)
    weight = 0.2 * jax.random.normal(kw, (C_in, C_out, K), jnp.float32)   # ConvT1d weight
    bias = 0.1 * jax.random.normal(kb, (C_out,), jnp.float32)             # ConvT1d bias
    ln_gamma = 1.0 + 0.1 * jax.random.normal(kg, (C_out,), jnp.float32)   # LayerNorm weight
    ln_beta = 0.1 * jax.random.normal(kbt, (C_out,), jnp.float32)         # LayerNorm bias

    fn = jax.jit(functools.partial(conv_transpose_layer_block, stride=S, padding=P))
    out = fn(x, weight, bias, ln_gamma, ln_beta)
    jax.block_until_ready(out)

    L_out_expected = (L_in - 1) * S - 2 * P + K
    assert out.shape == (N, C_out, L_out_expected), out.shape

    ref = _reference(x, weight, bias, ln_gamma, ln_beta, S, P)
    max_err = float(jnp.max(jnp.abs(out - ref)))
    # Exact-divide GELU + HIGHEST-precision matmuls keep this at ~1e-6.
    assert max_err < 1e-3, f"max abs err {max_err}"

    print("KERNEL_OK")
</pallas_src>

<mosaic_0001>
module attributes {stable_mosaic.version = 11 : i64} {
  func.func @kernel(%arg0: i32, %arg1: memref<32x16xf32, #tpu.memory_space<vmem>>, %arg2: memref<3x16x64xf32, #tpu.memory_space<vmem>>, %arg3: memref<64x64xf32, #tpu.memory_space<vmem>>, %arg4: memref<3x64xf32, #tpu.memory_space<vmem>>, %arg5: memref<24x64xf32, #tpu.memory_space<vmem>>) attributes {dimension_semantics = [#tpu.dimension_semantics<parallel>], iteration_bounds = array<i64: 2>, scalar_prefetch = 0 : i64, scratch_operands = 0 : i64, tpu.core_type = #tpu.core_type<tc>, window_params = [{transform_indices = @transform_0, window_bounds = array<i64: 32, 16>}, {pipeline_mode = #tpu.pipeline_mode<synchronous>, transform_indices = @transform_1, window_bounds = array<i64: 3, 16, 64>}, {pipeline_mode = #tpu.pipeline_mode<synchronous>, transform_indices = @transform_2, window_bounds = array<i64: 64, 64>}, {pipeline_mode = #tpu.pipeline_mode<synchronous>, transform_indices = @transform_3, window_bounds = array<i64: 3, 64>}, {transform_indices = @transform_4, window_bounds = array<i64: 24, 64>}]} {
    %c2 = arith.constant 2 : index
    %c0 = arith.constant 0 : index
    %0 = vector.load %arg1[%c2, %c0] : memref<32x16xf32, #tpu.memory_space<vmem>>, vector<24x16xf32>
    %c0_0 = arith.constant 0 : index
    %c0_1 = arith.constant 0 : index
    %c0_2 = arith.constant 0 : index
    %1 = vector.load %arg2[%c0_0, %c0_1, %c0_2] : memref<3x16x64xf32, #tpu.memory_space<vmem>>, vector<1x16x64xf32>
    %2 = vector.shape_cast %1 : vector<1x16x64xf32> to vector<16x64xf32>
    %cst = arith.constant dense<0.000000e+00> : vector<24x64xf32>
    %3 = tpu.matmul %0, %2, %cst {dimension_numbers = #tpu.dot_dimension_numbers<[1], [0], [0], [1], [0, 0, 1, 1], [], []>, precision = #tpu.contract_precision<fp32>} : vector<24x16xf32>, vector<16x64xf32>, vector<24x64xf32> -> vector<24x64xf32>
    %c1 = arith.constant 1 : index
    %c0_3 = arith.constant 0 : index
    %4 = vector.load %arg1[%c1, %c0_3] : memref<32x16xf32, #tpu.memory_space<vmem>>, vector<24x16xf32>
    %c1_4 = arith.constant 1 : index
    %c0_5 = arith.constant 0 : index
    %c0_6 = arith.constant 0 : index
    %5 = vector.load %arg2[%c1_4, %c0_5, %c0_6] : memref<3x16x64xf32, #tpu.memory_space<vmem>>, vector<1x16x64xf32>
    %6 = vector.shape_cast %5 : vector<1x16x64xf32> to vector<16x64xf32>
    %cst_7 = arith.constant dense<0.000000e+00> : vector<24x64xf32>
    %7 = tpu.matmul %4, %6, %cst_7 {dimension_numbers = #tpu.dot_dimension_numbers<[1], [0], [0], [1], [0, 0, 1, 1], [], []>, precision = #tpu.contract_precision<fp32>} : vector<24x16xf32>, vector<16x64xf32>, vector<24x64xf32> -> vector<24x64xf32>
    %8 = arith.addf %3, %7 : vector<24x64xf32>
    %c0_8 = arith.constant 0 : index
    %c0_9 = arith.constant 0 : index
    %9 = vector.load %arg1[%c0_8, %c0_9] : memref<32x16xf32, #tpu.memory_space<vmem>>, vector<24x16xf32>
    %c2_10 = arith.constant 2 : index
    %c0_11 = arith.constant 0 : index
    %c0_12 = arith.constant 0 : index
    %10 = vector.load %arg2[%c2_10, %c0_11, %c0_12] : memref<3x16x64xf32, #tpu.memory_space<vmem>>, vector<1x16x64xf32>
    %11 = vector.shape_cast %10 : vector<1x16x64xf32> to vector<16x64xf32>
    %cst_13 = arith.constant dense<0.000000e+00> : vector<24x64xf32>
    %12 = tpu.matmul %9, %11, %cst_13 {dimension_numbers = #tpu.dot_dimension_numbers<[1], [0], [0], [1], [0, 0, 1, 1], [], []>, precision = #tpu.contract_precision<fp32>} : vector<24x16xf32>, vector<16x64xf32>, vector<24x64xf32> -> vector<24x64xf32>
    %13 = arith.addf %8, %12 : vector<24x64xf32>
    %c0_14 = arith.constant 0 : index
    %c0_15 = arith.constant 0 : index
    %14 = vector.load %arg4[%c0_14, %c0_15] : memref<3x64xf32, #tpu.memory_space<vmem>>, vector<3x64xf32>
    %15 = vector.extract_strided_slice %14 {offsets = [0, 0], sizes = [1, 64], strides = [1, 1]} : vector<3x64xf32> to vector<1x64xf32>
    %16 = vector.broadcast %15 : vector<1x64xf32> to vector<24x64xf32>
    %17 = arith.addf %13, %16 : vector<24x64xf32>
    %c0_16 = arith.constant 0 : index
    %c0_17 = arith.constant 0 : index
    %18 = vector.load %arg3[%c0_16, %c0_17] : memref<64x64xf32, #tpu.memory_space<vmem>>, vector<64x64xf32>
    %cst_18 = arith.constant dense<0.000000e+00> : vector<24x64xf32>
    %19 = tpu.matmul %17, %18, %cst_18 {dimension_numbers = #tpu.dot_dimension_numbers<[1], [0], [0], [1], [0, 0, 1, 1], [], []>, precision = #tpu.contract_precision<fp32>} : vector<24x64xf32>, vector<64x64xf32>, vector<24x64xf32> -> vector<24x64xf32>
    %20 = arith.subf %17, %19 : vector<24x64xf32>
    %21 = arith.mulf %20, %20 : vector<24x64xf32>
    %cst_19 = arith.constant dense<0.000000e+00> : vector<24x64xf32>
    %22 = tpu.matmul %21, %18, %cst_19 {dimension_numbers = #tpu.dot_dimension_numbers<[1], [0], [0], [1], [0, 0, 1, 1], [], []>, precision = #tpu.contract_precision<fp32>} : vector<24x64xf32>, vector<64x64xf32>, vector<24x64xf32> -> vector<24x64xf32>
    %cst_20 = arith.constant 9.99999974E-6 : f32
    %23 = vector.broadcast %cst_20 : f32 to vector<24x64xf32>
    %24 = arith.addf %22, %23 : vector<24x64xf32>
    %25 = math.rsqrt %24 : vector<24x64xf32>
    %26 = arith.mulf %20, %25 : vector<24x64xf32>
    %27 = vector.extract_strided_slice %14 {offsets = [1, 0], sizes = [1, 64], strides = [1, 1]} : vector<3x64xf32> to vector<1x64xf32>
    %28 = vector.broadcast %27 : vector<1x64xf32> to vector<24x64xf32>
    %29 = arith.mulf %26, %28 : vector<24x64xf32>
    %30 = vector.extract_strided_slice %14 {offsets = [2, 0], sizes = [1, 64], strides = [1, 1]} : vector<3x64xf32> to vector<1x64xf32>
    %31 = vector.broadcast %30 : vector<1x64xf32> to vector<24x64xf32>
    %32 = arith.addf %29, %31 : vector<24x64xf32>
    %cst_21 = arith.constant 0.707106769 : f32
    %33 = vector.broadcast %cst_21 : f32 to vector<24x64xf32>
    %34 = arith.mulf %32, %33 : vector<24x64xf32>
    %35 = math.absf %34 : vector<24x64xf32>
    %cst_22 = arith.constant 0.327591091 : f32
    %36 = vector.broadcast %cst_22 : f32 to vector<24x64xf32>
    %37 = arith.mulf %36, %35 : vector<24x64xf32>
    %cst_23 = arith.constant 1.000000e+00 : f32
    %38 = vector.broadcast %cst_23 : f32 to vector<24x64xf32>
    %39 = arith.addf %38, %37 : vector<24x64xf32>
    %cst_24 = arith.constant 1.000000e+00 : f32
    %40 = vector.broadcast %cst_24 : f32 to vector<24x64xf32>
    %41 = arith.divf %40, %39 : vector<24x64xf32>
    %cst_25 = arith.constant 1.06140542 : f32
    %42 = vector.broadcast %cst_25 : f32 to vector<24x64xf32>
    %43 = arith.mulf %41, %42 : vector<24x64xf32>
    %cst_26 = arith.constant -1.45315206 : f32
    %44 = vector.broadcast %cst_26 : f32 to vector<24x64xf32>
    %45 = arith.addf %44, %43 : vector<24x64xf32>
    %46 = arith.mulf %41, %45 : vector<24x64xf32>
    %cst_27 = arith.constant 1.42141378 : f32
    %47 = vector.broadcast %cst_27 : f32 to vector<24x64xf32>
    %48 = arith.addf %47, %46 : vector<24x64xf32>
    %49 = arith.mulf %41, %48 : vector<24x64xf32>
    %cst_28 = arith.constant -0.284496725 : f32
    %50 = vector.broadcast %cst_28 : f32 to vector<24x64xf32>
    %51 = arith.addf %50, %49 : vector<24x64xf32>
    %52 = arith.mulf %41, %51 : vector<24x64xf32>
    %cst_29 = arith.constant 0.254829586 : f32
    %53 = vector.broadcast %cst_29 : f32 to vector<24x64xf32>
    %54 = arith.addf %53, %52 : vector<24x64xf32>
    %55 = arith.mulf %41, %54 : vector<24x64xf32>
    %cst_30 = arith.constant 0.000000e+00 : f32
    %56 = vector.broadcast %cst_30 : f32 to vector<24x64xf32>
    %57 = arith.subf %56, %35 : vector<24x64xf32>
    %58 = arith.mulf %57, %35 : vector<24x64xf32>
    %59 = math.exp %58 : vector<24x64xf32>
    %60 = arith.mulf %55, %59 : vector<24x64xf32>
    %cst_31 = arith.constant 1.000000e+00 : f32
    %61 = vector.broadcast %cst_31 : f32 to vector<24x64xf32>
    %62 = arith.subf %61, %60 : vector<24x64xf32>
    %cst_32 = arith.constant 0.000000e+00 : f32
    %63 = vector.broadcast %cst_32 : f32 to vector<24x64xf32>
    %64 = arith.cmpf oge, %34, %63 : vector<24x64xf32>
    %cst_33 = arith.constant 0.000000e+00 : f32
    %65 = vector.broadcast %cst_33 : f32 to vector<24x64xf32>
    %66 = arith.subf %65, %62 : vector<24x64xf32>
    %67 = arith.select %64, %62, %66 : vector<24x64xi1>, vector<24x64xf32>
    %cst_34 = arith.constant 5.000000e-01 : f32
    %68 = vector.broadcast %cst_34 : f32 to vector<24x64xf32>
    %69 = arith.mulf %68, %32 : vector<24x64xf32>
    %cst_35 = arith.constant 1.000000e+00 : f32
    %70 = vector.broadcast %cst_35 : f32 to vector<24x64xf32>
    %71 = arith.addf %70, %67 : vector<24x64xf32>
    %72 = arith.mulf %69, %71 : vector<24x64xf32>
    %c0_36 = arith.constant 0 : index
    %c0_37 = arith.constant 0 : index
    %73 = vector.load %arg5[%c0_36, %c0_37] : memref<24x64xf32, #tpu.memory_space<vmem>>, vector<24x64xf32>
    tpu.vector_store %arg5[%c0_36, %c0_37], %72 {strides = array<i32>} : memref<24x64xf32, #tpu.memory_space<vmem>>, vector<24x64xf32>,
    return
  }
  func.func @transform_0(%arg0: i32) -> (i32, i32) {
    %c0_i32 = arith.constant 0 : i32
    %c0_i32_0 = arith.constant 0 : i32
    return %arg0, %c0_i32 : i32, i32
  }
  func.func @transform_1(%arg0: i32) -> (i32, i32, i32) {
    %c0_i32 = arith.constant 0 : i32
    %c0_i32_0 = arith.constant 0 : i32
    %c0_i32_1 = arith.constant 0 : i32
    %c0_i32_2 = arith.constant 0 : i32
    return %c0_i32, %c0_i32_0, %c0_i32_1 : i32, i32, i32
  }
  func.func @transform_2(%arg0: i32) -> (i32, i32) {
    %c0_i32 = arith.constant 0 : i32
    %c0_i32_0 = arith.constant 0 : i32
    %c0_i32_1 = arith.constant 0 : i32
    return %c0_i32, %c0_i32_0 : i32, i32
  }
  func.func @transform_3(%arg0: i32) -> (i32, i32) {
    %c0_i32 = arith.constant 0 : i32
    %c0_i32_0 = arith.constant 0 : i32
    %c0_i32_1 = arith.constant 0 : i32
    return %c0_i32, %c0_i32_0 : i32, i32
  }
  func.func @transform_4(%arg0: i32) -> (i32, i32) {
    %c0_i32 = arith.constant 0 : i32
    %c0_i32_0 = arith.constant 0 : i32
    return %arg0, %c0_i32 : i32, i32
  }
}

</mosaic_0001>

<bundles_post_ra>
// kernel: tile.18
= control target key start
LH: loop header
LB: loop body
LE: loop exit
PB: predicated region body
PF: predicated region fallthrough
CT: control target
= control target key end

     0   :  { %s22_s0 = inlined_call_operand.vmem [shape: f32[32], index: 0, kind: input, shape index: {}]   ;;  %s23_s1 = inlined_call_operand.vmem [shape: f32[2,32], index: 1, kind: output, shape index: {}]  }
   0x1   :  { %v4_v0 = vld [vmem:[%s22_s0] ss:$0 sm:$0xff] }
   0x2   :  { %5 = vst [vmem:[%s23_s1] sm:$0x3] %v4_v0 }

// kernel: tile.27
= control target key start
LH: loop header
LB: loop body
LE: loop exit
PB: predicated region body
PF: predicated region fallthrough
CT: control target
= control target key end

     0   :  { %vm8_vm0 = vcmask 261120   ;;  %vm14_vm1 = vcmask 523520   ;;  %s42_s0 = inlined_call_operand.vmem [shape: f32[2,32], index: 0, kind: input, shape index: {}]   ;;  %s43_s1 = inlined_call_operand.vmem [shape: f32[1,64], index: 1, kind: output, shape index: {}]  }
   0x1   :  { %v5_v0 = vld [vmem:[%s42_s0] sm:$0x3]  ;;  %s25_s0 = smov 32  }
   0x2   :  { %6 = vst [vmem:[#allocation1] sm:$0x3] %v5_v0 }
   0x9   :  { %v11_v1 = vld [vmem:[#allocation1 + $0x1] sm:$0x1]   ;;  %v7_v2 = vld [vmem:[#allocation1] sm:$0x1]  }
   0xa   :  { %12 = vrot.lane.b32.xlu0 %v11_v1, %s25_s0  ;;  %9 = vst.msk [vmem:[#allocation0] sm:$0x1] %vm8_vm0, %v7_v2  }
  0x7c   :  { %v13_v3 = vpop.permute.xlu0 %12  }
  0x7d   :  { %15 = vst.msk [vmem:[#allocation0] sm:$0x1] %vm14_vm1, %v13_v3  }
  0x84   :  { %v20_v4 = vld [vmem:[#allocation0] sm:$0x1] }
  0x85   :  { %23 = vst [vmem:[%s43_s1] sm:$0x1] %v20_v4 }

// kernel: conv_transpose_layer_block.1
= control target key start
LH: loop header
LB: loop body
LE: loop exit
PB: predicated region body
PF: predicated region fallthrough
CT: control target
= control target key end

     0   :  { %s4164_s15 = smov 0   ;;  %s5100_s0 = inlined_call_operand.vmem [shape: f32[64,16], index: 0, kind: input, shape index: {}]   ;;  %s5101_s1 = inlined_call_operand.vmem [shape: f32[3,16,64], index: 1, kind: input, shape index: {}]   ;;  %s5102_s2 = inlined_call_operand.vmem [shape: f32[64,64], index: 2, kind: input, shape index: {}]   ;;  %s5103_s3 = inlined_call_operand.vmem [shape: f32[3,64], index: 3, kind: input, shape index: {}]   ;;  %s5104_s4 = inlined_call_operand.vmem [shape: f32[48,64], index: 4, kind: output, shape index: {}]  }
   0x1 LB: > { %s3331_s16 = sadd.s32 4294967295, %s4135_s15   ;;  %p3335_p0 = scmp.ge.s32.totalorder %s4135_s15, 1  ;;  %s4135_s15 = sphi %s4164_s15, %s14_s15  }
   0x2   : > { %p163_p1 = scmp.lt.s32.totalorder %s4135_s15, 3 }
   0x4   : > { %p164_p2 = pnand %p3335_p0, %p163_p1 }
   0x6   : > { %167 = sbr.rel (%p164_p2) target bundleno = 909 (0x38d), region = 36 }
   0xb   : > { %v3340_v0 = vld [vmem:[%s5101_s1 + $0x18] sm:$0xff]  ;;  %v3339_v1 = vld [vmem:[%s5101_s1 + $0x10] sm:$0xff]  ;;  %s3336_s21 = sshll.u32 %s3331_s16, 2  ;;  %v5105_v2 = vmov 0.0   ;;  %vm4138_vm0 = vmmov 0   ;;  %vm212_vm1 = vcmask 130048  }
   0xc   : > { %3567 = vmatprep.subr.mxu0 %v5105_v2  ;;  %v4181_v3 = vand.u32 4294901760, %v3340_v0  ;;  %3580 = vmatprep.subr.mxu1 %v5105_v2  ;;  %v4184_v4 = vand.u32 4294901760, %v3339_v1  ;;  %p190_p3 = scmp.lt.s32.totalorder %s3336_s21, 7  ;;  %v205_v32 = vld [vmem:[%s5101_s1 + $0x8] sm:$0xff]  ;;  %v204_v41 = vld [vmem:[%s5101_s1] sm:$0xff]  ;;  %vm1900_vm2 = vcmask 523264  }
   0xd   : > { %3571 = vmatprep.mubr.msk.f32.mxu0 %vm4138_vm0, %v5105_v2  ;;  %3584 = vmatprep.mubr.msk.f32.mxu1 %vm4138_vm0, %v5105_v2  ;;  %v4260_v39 = vand.u32 4294901760, %v205_v32  ;;  %v4282_v44 = vand.u32 4294901760, %v204_v41  ;;  %s195_s28 = smul.u32 3, %s3331_s16 }
   0xe   : > { %3568 = vmatpush3.msra.mxu0 %v4181_v3  ;;  %v4192_v5 = vsub.f32 %v3340_v0, %v4181_v3  ;;  %v4195_v6 = vsub.f32 %v3339_v1, %v4184_v4  ;;  %s5179_s21 = smov (!%p190_p3, %s3336_s21), 7 }
   0xf   : > { %3569 = vmatprep.subr.mxu0 %v5105_v2  ;;  %s3337_s22 = sshll.u32 %s5179_s21, 3  ;;  %v4277_v43 = vsub.f32 %v205_v32, %v4260_v39  ;;  %v4292_v46 = vsub.f32 %v204_v41, %v4282_v44  ;;  %p196_p4 = scmp.lt.s32.totalorder %s195_s28, 5 }
  0x10   : > { %v350_v7 = vand.u32 4294901760, %v4192_v5  ;;  %3570 = vmatpush3.msra.mxu0 %v4184_v4  ;;  %v357_v8 = vand.u32 4294901760, %v4195_v6  ;;  %s4205_s25 = scalar_lea.vmem %s5100_s0, %s3337_s22 }
  0x11   : > { %3593 = vmatprep.subr.mxu0 %v5105_v2  ;;  %v206_v11 = vld [vmem:[%s4205_s25 + $0x1] sm:$0xff]  ;;  %v207_v12 = vld [vmem:[%s4205_s25 + $0x9] sm:$0xff]  ;;  %v208_v13 = vld [vmem:[%s4205_s25 + $0x11] sm:$0xff]  ;;  %v904_v45 = vand.u32 4294901760, %v4277_v43  ;;  %v911_v50 = vand.u32 4294901760, %v4292_v46  ;;  %s5181_s28 = smov (!%p196_p4, %s195_s28), 5 }
  0x12   : > { %v351_v9 = vsub.f32 %v4192_v5, %v350_v7  ;;  %v358_v10 = vsub.f32 %v4195_v6, %v357_v8  ;;  %v214_v14 = vsel %vm212_vm1, %v206_v11, 0  ;;  %v217_v15 = vsel %vm212_vm1, %v207_v12, 0  ;;  %v1321_v30 = vld [vmem:[%s4205_s25] sm:$0xff]  ;;  %v1322_v31 = vld [vmem:[%s4205_s25 + $0x8] sm:$0xff]  ;;  %v1323_v34 = vld [vmem:[%s4205_s25 + $0x10] sm:$0xff]  ;;  %s3338_s16 = sshll.u32 %s5181_s28, 3 }
  0x13   : > { %v220_v16 = vsel %vm212_vm1, %v208_v13, 0  ;;  %v4219_v19 = vand.u32 4294901760, %v214_v14  ;;  %v4221_v20 = vand.u32 4294901760, %v217_v15  ;;  %v4252_v35 = vsel %vm212_vm1, %v1321_v30, 0  ;;  %v201_v47 = vld [vmem:[%s4205_s25 + $0x2] sm:$0xff]  ;;  %v202_v51 = vld [vmem:[%s4205_s25 + $0xa] sm:$0xff]  ;;  %s199_s5 = scalar_lea.vmem %s5104_s4, %s3338_s16 }
  0x14   : > { %v352_v17 = vand.u32 4294901760, %v351_v9  ;;  %v359_v18 = vand.u32 4294901760, %v358_v10  ;;  %v4223_v21 = vand.u32 4294901760, %v220_v16  ;;  %v4255_v36 = vsel %vm212_vm1, %v1322_v31, 0  ;;  %v203_v56 = vld [vmem:[%s4205_s25 + $0x12] sm:$0xff]  ;;  %v3341_v11 = vld [vmem:[%s5101_s1 + $0x20] sm:$0xff] }
  0x15   : > { %v290_v22 = vsub.f32 %v214_v14, %v4219_v19  ;;  %v4227_v23 = vsub.f32 %v217_v15, %v4221_v20  ;;  %v4266_v40 = vsel %vm212_vm1, %v1323_v34, 0  ;;  %v905_v48 = vsub.f32 %v4277_v43, %v904_v45 }
  0x16   : > { %3581 = vmatpush3.msra.mxu1 %v352_v17  ;;  %v4231_v24 = vsub.f32 %v220_v16, %v4223_v21  ;;  %v768_v49 = vsel %vm212_vm1, %v201_v47, 0  ;;  %v771_v54 = vsel %vm212_vm1, %v202_v51, 0  ;;  %v912_v55 = vsub.f32 %v4292_v46, %v911_v50  ;;  %v1895_v51 = vld [vmem:[%s5102_s2 + $0x18] sm:$0xff] }
  0x17   : > { %3582 = vmatprep.subr.mxu1 %v5105_v2  ;;  %v291_v25 = vand.u32 4294901760, %v290_v22  ;;  %v301_v26 = vand.u32 4294901760, %v4227_v23  ;;  %v906_v52 = vand.u32 4294901760, %v905_v48  ;;  %v4314_v53 = vand.u32 4294901760, %v768_v49 }
  0x18   : > { %3583 = vmatpush3.msra.mxu1 %v359_v18  ;;  %v311_v29 = vand.u32 4294901760, %v4231_v24  ;;  %v4330_v58 = vand.u32 4294901760, %v771_v54  ;;  %v774_v59 = vsel %vm212_vm1, %v203_v56, 0  ;;  %v913_v60 = vand.u32 4294901760, %v912_v55 }
  0x19   : > { %3585 = vmatmul.mubr.f32.vlgmr.msra.gmra.mxu1 %v4219_v19  ;;  %3606 = vmatprep.subr.mxu1 %v5105_v2  ;;  %v292_v27 = vsub.f32 %v290_v22, %v291_v25  ;;  %v302_v28 = vsub.f32 %v4227_v23, %v301_v26  ;;  %v4328_v57 = vsub.f32 %v768_v49, %v4314_v53  ;;  %v4346_v63 = vand.u32 4294901760, %v774_v59 }
  0x1a   : > { %3607 = vmatpush3.msra.mxu1 %v4181_v3  ;;  %3587 = vmatprep.mubr.msk.f32.mxu1 %vm4138_vm0, %v5105_v2  ;;  %v312_v38 = vsub.f32 %v4231_v24, %v311_v29  ;;  %v4344_v62 = vsub.f32 %v771_v54, %v4330_v58  ;;  %v4400_v14 = vand.u32 4294901760, %v3341_v11  ;;  %v4598_v56 = vand.u32 4294901760, %v1895_v51 }
  0x1b   : > { %3608 = vmatprep.subr.mxu1 %v5105_v2  ;;  %v293_v33 = vand.u32 4294901760, %v292_v27  ;;  %v303_v37 = vand.u32 4294901760, %v302_v28  ;;  %v845_v61 = vand.u32 4294901760, %v4328_v57  ;;  %v4458_v27 = vand.u32 4294901760, %v4266_v40 }
  0x1c   : > { %3609 = vmatpush3.msra.mxu1 %v4184_v4  ;;  %v313_v42 = vand.u32 4294901760, %v312_v38  ;;  %v855_v1 = vand.u32 4294901760, %v4344_v62  ;;  %v4410_v16 = vsub.f32 %v3341_v11, %v4400_v14 }
  0x1d   : > { %3588 = vmatmul.mubr.f32.gmra.mxu1 %v4221_v20  ;;  %3632 = vmatprep.subr.mxu1 %v5105_v2  ;;  %v846_v0 = vsub.f32 %v4328_v57, %v845_v61  ;;  %v1424_v30 = vsub.f32 %v4266_v40, %v4458_v27 }
  0x1e   : > { %3572 = vmatmul.mubr.f32.vlgmr.msra.gmra.mxu0 %v293_v33  ;;  %3590 = vmatprep.mubr.msk.f32.mxu1 %vm4138_vm0, %v5105_v2  ;;  %v1471_v18 = vand.u32 4294901760, %v4410_v16 }
  0x1f   : > { %3594 = vmatpush3.msra.mxu0 %v4192_v5  ;;  %3574 = vmatprep.mubr.msk.f32.mxu0 %vm4138_vm0, %v5105_v2  ;;  %v856_v5 = vsub.f32 %v4344_v62, %v855_v1  ;;  %v1425_v33 = vand.u32 4294901760, %v1424_v30 }
  0x20   : > { %3595 = vmatprep.subr.mxu0 %v5105_v2 }
  0x21   : > { %3596 = vmatpush3.msra.mxu0 %v4195_v6  ;;  %3591 = vmatmul.mubr.f32.gmra.mxu1 %v4223_v21 }
  0x22   : > { %3575 = vmatmul.mubr.f32.gmra.mxu0 %v303_v37  ;;  %3610 = vmatprep.mubr.msk.f32.mxu1 %vm4138_vm0, %v5105_v2  ;;  %v1899_v37 = vld [vmem:[%s5102_s2 + $0x38] sm:$0xff] }
  0x23   : > { %3577 = vmatprep.mubr.msk.f32.mxu0 %vm4138_vm0, %v5105_v2  ;;  %3619 = vmatprep.subr.mxu0 %v5105_v2  ;;  %v4544_v38 = vand.u32 4294901760, %v1899_v37 }
  0x25   : > { %3611 = vmatmul.mubr.f32.vlgmr.msra.gmra.mxu1 %v291_v25  ;;  %v4550_v40 = vsub.f32 %v1899_v37, %v4544_v38 }
  0x26   : > { %3578 = vmatmul.mubr.f32.gmra.mxu0 %v313_v42  ;;  %3633 = vmatpush3.msra.mxu1 %v4181_v3  ;;  %v864_v3 = vsub.f32 %v774_v59, %v4346_v63  ;;  %v1897_v42 = vld [vmem:[%s5102_s2 + $0x28] sm:$0xff] }
  0x27   : > { %3597 = vmatprep.mubr.msk.f32.mxu0 %vm4138_vm0, %v5105_v2  ;;  %3613 = vmatprep.mubr.msk.f32.mxu1 %vm4138_vm0, %v5105_v2 }
  0x28   : > { %3634 = vmatprep.subr.mxu1 %v5105_v2  ;;  %v865_v6 = vand.u32 4294901760, %v864_v3 }
  0x29   : > { %3614 = vmatmul.mubr.f32.gmra.mxu1 %v301_v26 }
  0x2a   : > { %3598 = vmatmul.mubr.f32.vlgmr.msra.gmra.mxu0 %v290_v22  ;;  %3616 = vmatprep.mubr.msk.f32.mxu1 %vm4138_vm0, %v5105_v2  ;;  %v866_v9 = vsub.f32 %v864_v3, %v865_v6 }
  0x2b   : > { %3620 = vmatpush3.msra.mxu0 %v350_v7  ;;  %3600 = vmatprep.mubr.msk.f32.mxu0 %vm4138_vm0, %v5105_v2  ;;  %v3342_v7 = vld [vmem:[%s5101_s1 + $0x28] sm:$0xff] }
  0x2c   : > { %3621 = vmatprep.subr.mxu0 %v5105_v2  ;;  %3635 = vmatpush3.msra.mxu1 %v4184_v4  ;;  %v847_v4 = vand.u32 4294901760, %v846_v0  ;;  %v4379_v10 = vand.u32 4294901760, %v3342_v7  ;;  %v867_v12 = vand.u32 4294901760, %v866_v9 }
  0x2d   : > { %3622 = vmatpush3.msra.mxu0 %v357_v8  ;;  %3617 = vmatmul.mubr.f32.gmra.mxu1 %v311_v29  ;;  %v857_v8 = vand.u32 4294901760, %v856_v5 }
  0x2e   : > { %3601 = vmatmul.mubr.f32.gmra.mxu0 %v4227_v23  ;;  %3636 = vmatprep.mubr.msk.f32.mxu1 %vm4138_vm0, %v5105_v2  ;;  %v4394_v13 = vsub.f32 %v3342_v7, %v4379_v10  ;;  %v4444_v23 = vand.u32 4294901760, %v4255_v36 }
  0x2f   : > { %3603 = vmatprep.mubr.msk.f32.mxu0 %vm4138_vm0, %v5105_v2  ;;  %3645 = vmatprep.subr.mxu0 %v5105_v2 }
  0x30   : > { %3658 = vmatprep.subr.mxu1 %v5105_v2  ;;  %v1464_v15 = vand.u32 4294901760, %v4394_v13  ;;  %v1414_v26 = vsub.f32 %v4255_v36, %v4444_v23 }
  0x31   : > { %3637 = vmatmul.mubr.f32.vlgmr.msra.gmra.mxu1 %v4219_v19 }
  0x32   : > { %3604 = vmatmul.mubr.f32.gmra.mxu0 %v4231_v24  ;;  %3659 = vmatpush3.msra.mxu1 %v906_v52  ;;  %v1465_v17 = vsub.f32 %v4394_v13, %v1464_v15  ;;  %v1415_v29 = vand.u32 4294901760, %v1414_v26 }
  0x33   : > { %3623 = vmatprep.mubr.msk.f32.mxu0 %vm4138_vm0, %v5105_v2  ;;  %3639 = vmatprep.mubr.msk.f32.mxu1 %vm4138_vm0, %v5105_v2 }
  0x34   : > { %3660 = vmatprep.subr.mxu1 %v5105_v2  ;;  %v1416_v32 = vsub.f32 %v1414_v26, %v1415_v29 }
  0x35   : > { %3640 = vmatmul.mubr.f32.gmra.mxu1 %v4221_v20 }
  0x36   : > { %3624 = vmatmul.mubr.f32.vlgmr.msra.gmra.mxu0 %v4219_v19  ;;  %3642 = vmatprep.mubr.msk.f32.mxu1 %vm4138_vm0, %v5105_v2  ;;  %v1466_v19 = vand.u32 4294901760, %v1465_v17  ;;  %v1417_v34 = vand.u32 4294901760, %v1416_v32 }
  0x37   : > { %3646 = vmatpush3.msra.mxu0 %v4260_v39  ;;  %3626 = vmatprep.mubr.msk.f32.mxu0 %vm4138_vm0, %v5105_v2 }
  0x38   : > { %3647 = vmatprep.subr.mxu0 %v5105_v2  ;;  %3661 = vmatpush3.msra.mxu1 %v913_v60 }
  0x39   : > { %3648 = vmatpush3.msra.mxu0 %v4282_v44  ;;  %3643 = vmatmul.mubr.f32.gmra.mxu1 %v4223_v21 }
  0x3a   : > { %3627 = vmatmul.mubr.f32.gmra.mxu0 %v4221_v20  ;;  %3662 = vmatprep.mubr.msk.f32.mxu1 %vm4138_vm0, %v5105_v2  ;;  %v4431_v20 = vand.u32 4294901760, %v4252_v35 }
  0x3b   : > { %3629 = vmatprep.mubr.msk.f32.mxu0 %vm4138_vm0, %v5105_v2  ;;  %3671 = vmatprep.subr.mxu0 %v5105_v2 }
  0x3c   : > { %3684 = vmatprep.subr.mxu1 %v5105_v2  ;;  %v1404_v22 = vsub.f32 %v4252_v35, %v4431_v20  ;;  %v1426_v35 = vsub.f32 %v1424_v30, %v1425_v33 }
  0x3d   : > { %3663 = vmatmul.mubr.f32.vlgmr.msra.gmra.mxu1 %v4314_v53 }
  0x3e   : > { %3630 = vmatmul.mubr.f32.gmra.mxu0 %v4223_v21  ;;  %3685 = vmatpush3.msra.mxu1 %v4260_v39  ;;  %v1472_v21 = vsub.f32 %v4410_v16, %v1471_v18  ;;  %v1405_v25 = vand.u32 4294901760, %v1404_v22  ;;  %v1427_v36 = vand.u32 4294901760, %v1426_v35 }
  0x3f   : > { %3649 = vmatprep.mubr.msk.f32.mxu0 %vm4138_vm0, %v5105_v2  ;;  %3665 = vmatprep.mubr.msk.f32.mxu1 %vm4138_vm0, %v5105_v2 }
  0x40   : > { %3686 = vmatprep.subr.mxu1 %v5105_v2  ;;  %v1473_v24 = vand.u32 4294901760, %v1472_v21  ;;  %v1406_v28 = vsub.f32 %v1404_v22, %v1405_v25 }
  0x41   : > { %3666 = vmatmul.mubr.f32.gmra.mxu1 %v4330_v58 }
  0x42   : > { %3650 = vmatmul.mubr.f32.vlgmr.msra.gmra.mxu0 %v847_v4  ;;  %3668 = vmatprep.mubr.msk.f32.mxu1 %vm4138_vm0, %v5105_v2  ;;  %v1407_v31 = vand.u32 4294901760, %v1406_v28 }
  0x43   : > { %3672 = vmatpush3.msra.mxu0 %v4277_v43  ;;  %3652 = vmatprep.mubr.msk.f32.mxu0 %vm4138_vm0, %v5105_v2  ;;  %v4560_v43 = vand.u32 4294901760, %v4550_v40 }
  0x44   : > { %3673 = vmatprep.subr.mxu0 %v5105_v2  ;;  %3687 = vmatpush3.msra.mxu1 %v4282_v44 }
  0x45   : > { %3674 = vmatpush3.msra.mxu0 %v4292_v46  ;;  %3669 = vmatmul.mubr.f32.gmra.mxu1 %v4346_v63  ;;  %5137 = vst [vmem:[#allocation2_spill] sm:$0xff] %v4560_v43  ;;  %v1896_v46 = vld [vmem:[%s5102_s2 + $0x20] sm:$0xff]  ;;  %v2033_v47 = vsub.f32 %v4550_v40, %v4560_v43 }
  0x46   : > { %3653 = vmatmul.mubr.f32.gmra.mxu0 %v857_v8  ;;  %3688 = vmatprep.mubr.msk.f32.mxu1 %vm4138_vm0, %v5105_v2 }
  0x47   : > { %3655 = vmatprep.mubr.msk.f32.mxu0 %vm4138_vm0, %v5105_v2  ;;  %3697 = vmatprep.subr.mxu0 %v5105_v2  ;;  %v4587_v52 = vand.u32 4294901760, %v2033_v47 }
  0x48   : > { %3710 = vmatprep.subr.mxu1 %v5105_v2 }
  0x49   : > { %3689 = vmatmul.mubr.f32.vlgmr.msra.gmra.mxu1 %v845_v61  ;;  %5139 = vst [vmem:[#allocation4_spill] sm:$0xff] %v4587_v52 }
  0x4a   : > { %3656 = vmatmul.mubr.f32.gmra.mxu0 %v867_v12  ;;  %3711 = vmatpush3.msra.mxu1 %v4260_v39  ;;  %v1898_v39 = vld [vmem:[%s5102_s2 + $0x30] sm:$0xff] }
  0x4b   : > { %3675 = vmatprep.mubr.msk.f32.mxu0 %vm4138_vm0, %v5105_v2  ;;  %3691 = vmatprep.mubr.msk.f32.mxu1 %vm4138_vm0, %v5105_v2  ;;  %v4552_v41 = vand.u32 4294901760, %v1898_v39 }
  0x4c   : > { %3712 = vmatprep.subr.mxu1 %v5105_v2 }
  0x4d   : > { %3692 = vmatmul.mubr.f32.gmra.mxu1 %v855_v1 }
  0x4e   : > { %3676 = vmatmul.mubr.f32.vlgmr.msra.gmra.mxu0 %v4328_v57  ;;  %3694 = vmatprep.mubr.msk.f32.mxu1 %vm4138_vm0, %v5105_v2  ;;  %v1894_v57 = vld [vmem:[%s5102_s2 + $0x10] sm:$0xff] }
  0x4f   : > { %3698 = vmatpush3.msra.mxu0 %v904_v45  ;;  %3678 = vmatprep.mubr.msk.f32.mxu0 %vm4138_vm0, %v5105_v2  ;;  %v4565_v45 = vand.u32 4294901760, %v1897_v42  ;;  %v4612_v61 = vand.u32 4294901760, %v1894_v57 }
  0x50   : > { %3699 = vmatprep.subr.mxu0 %v5105_v2  ;;  %3713 = vmatpush3.msra.mxu1 %v4282_v44  ;;  %v4563_v44 = vsub.f32 %v1898_v39, %v4552_v41 }
  0x51   : > { %3700 = vmatpush3.msra.mxu0 %v911_v50  ;;  %3695 = vmatmul.mubr.f32.gmra.mxu1 %v865_v6  ;;  %v4578_v49 = vsub.f32 %v1897_v42, %v4565_v45  ;;  %v4580_v50 = vand.u32 4294901760, %v1896_v46  ;;  %v1892_v6 = vld [vmem:[%s5102_s2] sm:$0xff] }
  0x52   : > { %3679 = vmatmul.mubr.f32.gmra.mxu0 %v4344_v62  ;;  %3714 = vmatprep.mubr.msk.f32.mxu1 %vm4138_vm0, %v5105_v2  ;;  %v4575_v48 = vand.u32 4294901760, %v4563_v44  ;;  %v4616_v62 = vsub.f32 %v1895_v51, %v4598_v56 }
  0x53   : > { %3681 = vmatprep.mubr.msk.f32.mxu0 %vm4138_vm0, %v5105_v2  ;;  %3723 = vmatprep.subr.mxu0 %v5105_v2  ;;  %v4592_v54 = vand.u32 4294901760, %v4578_v49  ;;  %v4595_v55 = vsub.f32 %v1896_v46, %v4580_v50 }
  0x54   : > { %3736 = vmatprep.subr.mxu1 %v5105_v2  ;;  %5138 = vst [vmem:[#allocation3_spill] sm:$0xff] %v4575_v48  ;;  %v4635_v5 = vand.u32 4294901760, %v4616_v62 }
  0x55   : > { %3715 = vmatmul.mubr.f32.vlgmr.msra.gmra.mxu1 %v4314_v53  ;;  %5140 = vst [vmem:[#allocation5_spill] sm:$0xff] %v4592_v54  ;;  %v2047_v59 = vsub.f32 %v4578_v49, %v4592_v54  ;;  %v4610_v60 = vand.u32 4294901760, %v4595_v55 }
  0x56   : > { %3682 = vmatmul.mubr.f32.gmra.mxu0 %v864_v3  ;;  %3737 = vmatpush3.msra.mxu1 %v1466_v19  ;;  %v4628_v3 = vsub.f32 %v1894_v57, %v4612_v61  ;;  %5144 = vst [vmem:[#allocation9_spill] sm:$0xff] %v4635_v5  ;;  %v2061_v11 = vsub.f32 %v4616_v62, %v4635_v5 }
  0x57   : > { %3701 = vmatprep.mubr.msk.f32.mxu0 %vm4138_vm0, %v5105_v2  ;;  %3717 = vmatprep.mubr.msk.f32.mxu1 %vm4138_vm0, %v5105_v2  ;;  %5142 = vst [vmem:[#allocation7_spill] sm:$0xff] %v4610_v60  ;;  %v4623_v0 = vand.u32 4294901760, %v2047_v59  ;;  %v2054_v1 = vsub.f32 %v4595_v55, %v4610_v60 }
  0x58   : > { %3738 = vmatprep.subr.mxu1 %v5105_v2  ;;  %v4645_v8 = vand.u32 4294901760, %v4628_v3 }
  0x59   : > { %3718 = vmatmul.mubr.f32.gmra.mxu1 %v4330_v58  ;;  %5143 = vst [vmem:[#allocation8_spill] sm:$0xff] %v4623_v0  ;;  %v4642_v7 = vand.u32 4294901760, %v2054_v1 }
  0x5a   : > { %3702 = vmatmul.mubr.f32.vlgmr.msra.gmra.mxu0 %v4314_v53  ;;  %3720 = vmatprep.mubr.msk.f32.mxu1 %vm4138_vm0, %v5105_v2  ;;  %v2040_v53 = vsub.f32 %v4563_v44, %v4575_v48  ;;  %5146 = vst [vmem:[#allocation11_spill] sm:$0xff] %v4645_v8  ;;  %v2068_v12 = vsub.f32 %v4628_v3, %v4645_v8 }
  0x5b   : > { %3724 = vmatpush3.msra.mxu0 %v4379_v10  ;;  %3704 = vmatprep.mubr.msk.f32.mxu0 %vm4138_vm0, %v5105_v2  ;;  %5145 = vst [vmem:[#allocation10_spill] sm:$0xff] %v4642_v7 }
  0x5c   : > { %3725 = vmatprep.subr.mxu0 %v5105_v2  ;;  %3739 = vmatpush3.msra.mxu1 %v1473_v24 }
  0x5d   : > { %3726 = vmatpush3.msra.mxu0 %v4400_v14  ;;  %3721 = vmatmul.mubr.f32.gmra.mxu1 %v4346_v63 }
  0x5e   : > { %3705 = vmatmul.mubr.f32.gmra.mxu0 %v4330_v58  ;;  %3740 = vmatprep.mubr.msk.f32.mxu1 %vm4138_vm0, %v5105_v2  ;;  %v4605_v58 = vand.u32 4294901760, %v2040_v53 }
  0x5f   : > { %3707 = vmatprep.mubr.msk.f32.mxu0 %vm4138_vm0, %v5105_v2  ;;  %3749 = vmatprep.subr.mxu0 %v5105_v2 }
  0x60   : > { %3762 = vmatprep.subr.mxu1 %v5105_v2  ;;  %5141 = vst [vmem:[#allocation6_spill] sm:$0xff] %v4605_v58 }
  0x61   : > { %3741 = vmatmul.mubr.f32.vlgmr.msra.gmra.mxu1 %v4431_v20 }
  0x62   : > { %3708 = vmatmul.mubr.f32.gmra.mxu0 %v4346_v63  ;;  %3763 = vmatpush3.msra.mxu1 %v4379_v10  ;;  %v1893_v63 = vld [vmem:[%s5102_s2 + $0x8] sm:$0xff] }
  0x63   : > { %3727 = vmatprep.mubr.msk.f32.mxu0 %vm4138_vm0, %v5105_v2  ;;  %3743 = vmatprep.mubr.msk.f32.mxu1 %vm4138_vm0, %v5105_v2  ;;  %v4630_v4 = vand.u32 4294901760, %v1893_v63 }
  0x64   : > { %3764 = vmatprep.subr.mxu1 %v5105_v2 }
  0x65   : > { %3744 = vmatmul.mubr.f32.gmra.mxu1 %v4444_v23  ;;  %v4648_v9 = vsub.f32 %v1893_v63, %v4630_v4 }
  0x66   : > { %3728 = vmatmul.mubr.f32.vlgmr.msra.gmra.mxu0 %v1407_v31  ;;  %3746 = vmatprep.mubr.msk.f32.mxu1 %vm4138_vm0, %v5105_v2 }
  0x67   : > { %3750 = vmatpush3.msra.mxu0 %v4394_v13  ;;  %3730 = vmatprep.mubr.msk.f32.mxu0 %vm4138_vm0, %v5105_v2  ;;  %5147 = vst [vmem:[#allocation12_spill] sm:$0xff] %v4648_v9  ;;  %v4661_v13 = vand.u32 4294901760, %v4648_v9 }
  0x68   : > { %3751 = vmatprep.subr.mxu0 %v5105_v2  ;;  %3765 = vmatpush3.msra.mxu1 %v4400_v14 }
  0x69   : > { %3752 = vmatpush3.msra.mxu0 %v4410_v16  ;;  %3747 = vmatmul.mubr.f32.gmra.mxu1 %v4458_v27  ;;  %5148 = vst [vmem:[#allocation13_spill] sm:$0xff] %v4661_v13  ;;  %v4671_v16 = vand.u32 4294901760, %v2068_v12  ;;  %v2075_v17 = vsub.f32 %v4648_v9, %v4661_v13 }
  0x6a   : > { %3731 = vmatmul.mubr.f32.gmra.mxu0 %v1417_v34  ;;  %3766 = vmatprep.mubr.msk.f32.mxu1 %vm4138_vm0, %v5105_v2 }
  0x6b   : > { %3733 = vmatprep.mubr.msk.f32.mxu0 %vm4138_vm0, %v5105_v2  ;;  %3775 = vmatprep.subr.mxu0 %v5105_v2  ;;  %5151 = vst [vmem:[#allocation16_spill] sm:$0xff] %v4671_v16  ;;  %v4681_v19 = vand.u32 4294901760, %v2075_v17 }
  0x6c   : > { %3788 = vmatprep.subr.mxu1 %v5105_v2 }
  0x6d   : > { %3767 = vmatmul.mubr.f32.vlgmr.msra.gmra.mxu1 %v1405_v25  ;;  %5153 = vst [vmem:[#allocation18_spill] sm:$0xff] %v4681_v19 }
  0x6e   : > { %3734 = vmatmul.mubr.f32.gmra.mxu0 %v1427_v36  ;;  %3789 = vmatpush3.msra.mxu1 %v4379_v10  ;;  %v4650_v10 = vand.u32 4294901760, %v1892_v6 }
  0x6f   : > { %3753 = vmatprep.mubr.msk.f32.mxu0 %vm4138_vm0, %v5105_v2  ;;  %3769 = vmatprep.mubr.msk.f32.mxu1 %vm4138_vm0, %v5105_v2 }
  0x70   : > { %3790 = vmatprep.subr.mxu1 %v5105_v2 }
  0x71   : > { %3770 = vmatmul.mubr.f32.gmra.mxu1 %v1415_v29 }
  0x72   : > { %3754 = vmatmul.mubr.f32.vlgmr.msra.gmra.mxu0 %v1404_v22  ;;  %3772 = vmatprep.mubr.msk.f32.mxu1 %vm4138_vm0, %v5105_v2  ;;  %v1885_v22 = vlaneseq }
  0x73   : > { %3776 = vmatpush3.msra.mxu0 %v1464_v15  ;;  %3756 = vmatprep.mubr.msk.f32.mxu0 %vm4138_vm0, %v5105_v2  ;;  %v4668_v15 = vand.u32 4294901760, %v2061_v11 }
  0x74   : > { %3777 = vmatprep.subr.mxu0 %v5105_v2  ;;  %3791 = vmatpush3.msra.mxu1 %v4400_v14  ;;  %v4664_v14 = vsub.f32 %v1892_v6, %v4650_v10 }
  0x75   : > { %3778 = vmatpush3.msra.mxu0 %v1471_v18  ;;  %3773 = vmatmul.mubr.f32.gmra.mxu1 %v1425_v33  ;;  %5150 = vst [vmem:[#allocation15_spill] sm:$0xff] %v4668_v15 }
  0x76   : > { %3757 = vmatmul.mubr.f32.gmra.mxu0 %v1414_v26  ;;  %3792 = vmatprep.mubr.msk.f32.mxu1 %vm4138_vm0, %v5105_v2  ;;  %5149 = vst [vmem:[#allocation14_spill] sm:$0xff] %v4664_v14  ;;  %v4676_v18 = vand.u32 4294901760, %v4664_v14  ;;  %v4700_v26 = vld [vmem:[%s5103_s3] sm:$0x7] }
  0x77   : > { %3759 = vmatprep.mubr.msk.f32.mxu0 %vm4138_vm0, %v5105_v2  ;;  %3826 = vmatprep.subr.mxu1 %v5105_v2 }
  0x78   : > { %3801 = vmatprep.subr.mxu0 %v5105_v2  ;;  %5152 = vst [vmem:[#allocation17_spill] sm:$0xff] %v4676_v18 }
  0x79   : > { %3793 = vmatmul.mubr.f32.vlgmr.msra.gmra.mxu1 %v4431_v20 }
  0x7a   : > { %3760 = vmatmul.mubr.f32.gmra.mxu0 %v1424_v30  ;;  %3795 = vmatprep.mubr.msk.f32.mxu1 %vm4138_vm0, %v5105_v2 }
  0x7b   : > { %3779 = vmatprep.mubr.msk.f32.mxu0 %vm4138_vm0, %v5105_v2  ;;  %3827 = vmatpush3.msra.mxu1 %v4587_v52 }
  0x7c   : > { %3828 = vmatprep.subr.mxu1 %v5105_v2 }
  0x7d   : > { %3796 = vmatmul.mubr.f32.gmra.mxu1 %v4444_v23 }
  0x7e   : > { %3780 = vmatmul.mubr.f32.vlgmr.msra.gmra.mxu0 %v4431_v20  ;;  %3798 = vmatprep.mubr.msk.f32.mxu1 %vm4138_vm0, %v5105_v2  ;;  %v2082_v20 = vsub.f32 %v4664_v14, %v4676_v18 }
  0x7f   : > { %3782 = vmatprep.mubr.msk.f32.mxu0 %vm4138_vm0, %v5105_v2  ;;  %3802 = vmatpush3.msra.mxu0 %v4544_v38 }
  0x80   : > { %3803 = vmatprep.subr.mxu0 %v5105_v2  ;;  %3829 = vmatpush3.msra.mxu1 %v4605_v58  ;;  %v4687_v21 = vand.u32 4294901760, %v2082_v20 }
  0x81   : > { %3799 = vmatmul.mubr.f32.gmra.mxu1 %v4458_v27  ;;  %3804 = vmatpush3.msra.mxu0 %v4552_v41 }
  0x82   : > { %3783 = vmatmul.mubr.f32.gmra.mxu0 %v4444_v23  ;;  %3842 = vmatprep.mubr.msk.f32.mxu1 %vm4138_vm0, %v5105_v2  ;;  %5154 = vst [vmem:[#allocation19_spill] sm:$0xff] %v4687_v21  ;;  %v4693_v23 = vshrl.u32 %v1885_v22, 7 }
  0x83   : > { %3785 = vmatprep.mubr.msk.f32.mxu0 %vm4138_vm0, %v5105_v2  ;;  %3805 = vmatprep.subr.mxu0 %v5105_v2 }
  0x84   : > { %3806 = vmatpush3.msra.mxu0 %v4565_v45  ;;  %3830 = vmatprep.subr.mxu1 %v5105_v2  ;;  %v3179_v24 = vsub.s32 1, %v4693_v23  ;;  %v3186_v25 = vsub.s32 2, %v4693_v23 }
  0x85   : > { %3807 = vmatprep.subr.mxu0 %v5105_v2  ;;  %3831 = vmatpush3.msra.mxu1 %v4623_v0 }
  0x86   : > { %3786 = vmatmul.mubr.f32.gmra.mxu0 %v4458_v27  ;;  %3832 = vmatprep.subr.mxu1 %v5105_v2  ;;  %v4703_v27 = vrot.slane %v4700_v26, %v3179_v24  ;;  %v4706_v28 = vrot.slane %v4700_v26, %v3186_v25 }
  0x87   : > { %3817 = vmatprep.mubr.msk.f32.mxu0 %vm4138_vm0, %v5105_v2  ;;  %3808 = vmatpush3.msra.mxu0 %v4580_v50 }
  0x88   : > { %3809 = vmatprep.subr.mxu0 %v5105_v2  ;;  %3833 = vmatpush3.msra.mxu1 %v4642_v7  ;;  %5155 = vst [vmem:[#allocation20_spill] sm:$0xff] %v4703_v27  ;;  %5156 = vst [vmem:[#allocation21_spill] sm:$0xff] %v4706_v28 }
  0x89   : > { %3810 = vmatpush3.msra.mxu0 %v4598_v56  ;;  %3834 = vmatprep.subr.mxu1 %v5105_v2 }
  0x8a   : > { %3811 = vmatprep.subr.mxu0 %v5105_v2  ;;  %3835 = vmatpush3.msra.mxu1 %v4668_v15 }
  0x8b   : > { %3812 = vmatpush3.msra.mxu0 %v4612_v61  ;;  %3836 = vmatprep.subr.mxu1 %v5105_v2 }
  0x8c   : > { %3813 = vmatprep.subr.mxu0 %v5105_v2  ;;  %3837 = vmatpush3.msra.mxu1 %v4671_v16 }
  0x8d   : > { %3814 = vmatpush3.msra.mxu0 %v4630_v4  ;;  %3838 = vmatprep.subr.mxu1 %v5105_v2 }
  0x8e   : > { %3815 = vmatprep.subr.mxu0 %v5105_v2  ;;  %3839 = vmatpush3.msra.mxu1 %v4681_v19 }
  0x8f   : > { %3816 = vmatpush3.msra.mxu0 %v4650_v10  ;;  %3840 = vmatprep.subr.mxu1 %v5105_v2 }
  0x90   : > { %3851 = vmatprep.subr.mxu0 %v5105_v2  ;;  %3841 = vmatpush3.msra.mxu1 %v4687_v21 }
  0x91   : > { %3876 = vmatprep.subr.mxu1 %v5105_v2 }
  0xd9   : > { %v396_v29 = vpop.f32.mrf.mxu1 }
  0xdb   : > { %v3586_v30 = vpop.f32.mrf.mxu1 }
  0xdd   : > { %v402_v31 = vpop.f32.mrf.mxu1 }
  0xde   : > { %v295_v32 = vpop.f32.mrf.mxu0 }
  0xdf   : > { %v397_v33 = vadd.f32 %v396_v29, %v295_v32  ;;  %v3589_v34 = vpop.f32.mrf.mxu1 }
  0xe0   : > { %v3573_v35 = vpop.f32.mrf.mxu0 }
  0xe1   : > { %v408_v36 = vpop.f32.mrf.mxu1 }
  0xe2   : > { %v305_v37 = vpop.f32.mrf.mxu0 }
  0xe3   : > { %v403_v39 = vadd.f32 %v402_v31, %v305_v37  ;;  %v3592_v42 = vpop.f32.mrf.mxu1 }
  0xe4   : > { %v3576_v46 = vpop.f32.mrf.mxu0 }
  0xe5   : > { %v573_v47 = vpop.f32.mrf.mxu1 }
  0xe6   : > { %v315_v51 = vpop.f32.mrf.mxu0 }
  0xe7   : > { %v409_v53 = vadd.f32 %v408_v36, %v315_v51  ;;  %v3612_v57 = vpop.f32.mrf.mxu1 }
  0xe8   : > { %v3579_v59 = vpop.f32.mrf.mxu0 }
  0xe9   : > { %v581_v63 = vpop.f32.mrf.mxu1 }
  0xea   : > { %v484_v1 = vpop.f32.mrf.mxu0 }
  0xeb   : > { %v485_v6 = vadd.f32 %v484_v1, %v397_v33  ;;  %v3615_v11 = vpop.f32.mrf.mxu1 }
  0xec   : > { %v3599_v12 = vpop.f32.mrf.mxu0 }
  0xed   : > { %v574_v17 = vadd.f32 %v573_v47, %v485_v6  ;;  %v589_v20 = vpop.f32.mrf.mxu1 }
  0xee   : > { %v491_v22 = vpop.f32.mrf.mxu0 }
  0xef   : > { %v492_v24 = vadd.f32 %v491_v22, %v403_v39  ;;  %v3618_v25 = vpop.f32.mrf.mxu1 }
  0xf0   : > { %v3602_v29 = vpop.f32.mrf.mxu0 }
  0xf1   : > { %v582_v30 = vadd.f32 %v581_v63, %v492_v24  ;;  %v751_v31 = vpop.f32.mrf.mxu1 }
  0xf2   : > { %v498_v32 = vpop.f32.mrf.mxu0 }
  0xf3   : > { %v499_v34 = vadd.f32 %v498_v32, %v409_v53  ;;  %v3638_v35 = vpop.f32.mrf.mxu1 }
  0xf4   : > { %v3605_v37 = vpop.f32.mrf.mxu0 }
  0xf5   : > { %v590_v36 = vadd.f32 %v589_v20, %v499_v34  ;;  %v757_v42 = vpop.f32.mrf.mxu1 }
  0xf6   : > { %v666_v46 = vpop.f32.mrf.mxu0 }
  0xf7   : > { %v667_v51 = vadd.f32 %v666_v46, %v574_v17  ;;  %v3641_v57 = vpop.f32.mrf.mxu1 }
  0xf8   : > { %v3625_v33 = vpop.f32.mrf.mxu0 }
  0xf9   : > { %v752_v59 = vadd.f32 %v751_v31, %v667_v51  ;;  %v763_v1 = vpop.f32.mrf.mxu1 }
  0xfa   : > { %v672_v47 = vpop.f32.mrf.mxu0 }
  0xfb   : > { %v673_v6 = vadd.f32 %v672_v47, %v582_v30  ;;  %v3644_v11 = vpop.f32.mrf.mxu1 }
  0xfc   : > { %v3628_v39 = vpop.f32.mrf.mxu0 }
  0xfd   : > { %v758_v12 = vadd.f32 %v757_v42, %v673_v6  ;;  %v950_v22 = vpop.f32.mrf.mxu1 }
  0xfe   : > { %v678_v63 = vpop.f32.mrf.mxu0 }
  0xff   : > { %v679_v24 = vadd.f32 %v678_v63, %v590_v36  ;;  %v3664_v25 = vpop.f32.mrf.mxu1 }
 0x100   : > { %v3631_v53 = vpop.f32.mrf.mxu0 }
 0x101   : > { %v4708_v29 = vadd.f32 %v763_v1, %v679_v24  ;;  %v956_v20 = vpop.f32.mrf.mxu1 }
 0x102   : > { %v849_v32 = vpop.f32.mrf.mxu0 }
 0x103   : > { %v3667_v34 = vpop.f32.mrf.mxu1  ;;  %v850_v52 = vadd.f32 %v849_v32, %v752_v59 }
 0x104   : > { %v3651_v17 = vpop.f32.mrf.mxu0 }
 0x105   : > { %v4710_v35 = vpop.f32.mrf.mxu1 }
 0x106   : > { %v859_v31 = vpop.f32.mrf.mxu0 }
 0x107   : > { %v3670_v37 = vpop.f32.mrf.mxu1  ;;  %v860_v8 = vadd.f32 %v859_v31, %v758_v12 }
 0x108   : > { %v3654_v46 = vpop.f32.mrf.mxu0 }
 0x109   : > { %v1127_v30 = vpop.f32.mrf.mxu1  ;;  %v957_v48 = vadd.f32 %v956_v20, %v860_v8 }
 0x10a   : > { %v869_v51 = vpop.f32.mrf.mxu0 }
 0x10b   : > { %v3690_v57 = vpop.f32.mrf.mxu1 }
 0x10c   : > { %v3657_v42 = vpop.f32.mrf.mxu0 }
 0x10d   : > { %v4712_v33 = vpop.f32.mrf.mxu1 }
 0x10e   : > { %v1038_v36 = vpop.f32.mrf.mxu0 }
 0x10f   : > { %v3693_v47 = vpop.f32.mrf.mxu1 }
 0x110   : > { %v3677_v6 = vpop.f32.mrf.mxu0 }
 0x111   : > { %v4714_v1 = vpop.f32.mrf.mxu1 }
 0x112   : > { %v1045_v11 = vpop.f32.mrf.mxu0 }
 0x113   : > { %v3696_v39 = vpop.f32.mrf.mxu1 }
 0x114   : > { %v3680_v63 = vpop.f32.mrf.mxu0 }
 0x115   : > { %v4716_v24 = vpop.f32.mrf.mxu1 }
 0x116   : > { %v1052_v25 = vpop.f32.mrf.mxu0 }
 0x117   : > { %v3716_v53 = vpop.f32.mrf.mxu1 }
 0x118   : > { %v3683_v34 = vpop.f32.mrf.mxu0 }
 0x119   : > { %v4718_v17 = vpop.f32.mrf.mxu1 }
 0x11a   : > { %v1220_v37 = vpop.f32.mrf.mxu0 }
 0x11b   : > { %v3719_v46 = vpop.f32.mrf.mxu1 }
 0x11c   : > { %v3703_v57 = vpop.f32.mrf.mxu0 }
 0x11d   : > { %v4720_v42 = vpop.f32.mrf.mxu1 }
 0x11e   : > { %v1226_v2 = vpop.f32.mrf.mxu0 }
 0x11f   : > { %v3722_v47 = vpop.f32.mrf.mxu1 }
 0x120   : > { %v3706_v6 = vpop.f32.mrf.mxu0 }
 0x121   : > { %v1510_v28 = vpop.f32.mrf.mxu1 }
 0x122   : > { %v4722_v27 = vpop.f32.mrf.mxu0 }
 0x123   : > { %v3742_v39 = vpop.f32.mrf.mxu1 }
 0x124   : > { %v3709_v63 = vpop.f32.mrf.mxu0  ;;  %v951_v39 = vadd.f32 %v950_v22, %v850_v52 }
 0x125   : > { %v1516_v21 = vpop.f32.mrf.mxu1 }
 0x126   : > { %v1409_v19 = vpop.f32.mrf.mxu0  ;;  %v1039_v54 = vadd.f32 %v1038_v36, %v951_v39 }
 0x127   : > { %v3745_v16 = vpop.f32.mrf.mxu1 }
 0x128   : > { %v3729_v53 = vpop.f32.mrf.mxu0  ;;  %v1511_v16 = vadd.f32 %v1510_v28, %v1409_v19  ;;  %v1128_v59 = vadd.f32 %v1127_v30, %v1039_v54 }
 0x129   : > { %v1522_v34 = vpop.f32.mrf.mxu1 }
 0x12a   : > { %v1419_v15 = vpop.f32.mrf.mxu0  ;;  %v1221_v12 = vadd.f32 %v1220_v37, %v1128_v59 }
 0x12b   : > { %v3748_v7 = vpop.f32.mrf.mxu1  ;;  %v1517_v32 = vadd.f32 %v1516_v21, %v1419_v15 }
 0x12c   : > { %v3732_v0 = vpop.f32.mrf.mxu0  ;;  %v1306_v15 = vadd.f32 %v4716_v24, %v1221_v12 }
 0x12d   : > { %v1687_v46 = vpop.f32.mrf.mxu1  ;;  %v870_v0 = vadd.f32 %v869_v51, %v4708_v29 }
 0x12e   : > { %v1429_v57 = vpop.f32.mrf.mxu0 }
 0x12f   : > { %v3768_v58 = vpop.f32.mrf.mxu1  ;;  %v963_v52 = vadd.f32 %v4710_v35, %v870_v0  ;;  %v1523_v20 = vadd.f32 %v1522_v34, %v1429_v57 }
 0x130   : > { %v3735_v18 = vpop.f32.mrf.mxu0  ;;  %v1046_v58 = vadd.f32 %v1045_v11, %v957_v48 }
 0x131   : > { %v1695_v47 = vpop.f32.mrf.mxu1  ;;  %v1053_v29 = vadd.f32 %v1052_v25, %v963_v52 }
 0x132   : > { %v1598_v6 = vpop.f32.mrf.mxu0 }
 0x133   : > { %v3771_v13 = vpop.f32.mrf.mxu1  ;;  %v1599_v7 = vadd.f32 %v1598_v6, %v1511_v16 }
 0x134   : > { %v3755_v5 = vpop.f32.mrf.mxu0 }
 0x135   : > { %v1703_v63 = vpop.f32.mrf.mxu1  ;;  %v1887_v5 = vsub.s32 0, %v4693_v23  ;;  %v1688_v22 = vadd.f32 %v1687_v46, %v1599_v7  ;;  %v5157_v7 = vmov 0.0  }
 0x136   : > { %v1605_v60 = vpop.f32.mrf.mxu0 }
 0x137   : > { %v3774_v53 = vpop.f32.mrf.mxu1  ;;  %v1606_v19 = vadd.f32 %v1605_v60, %v1517_v32  ;;  %v1888_v54 = vrot.slane %v4700_v26, %v1887_v5  ;;  %v1144_v60 = vadd.f32 %v4714_v1, %v1053_v29 }
 0x138   : > { %v3758_v43 = vpop.f32.mrf.mxu0 }
 0x139   : > { %v1865_v14 = vpop.f32.mrf.mxu1  ;;  %v1136_v43 = vadd.f32 %v4712_v33, %v1046_v58  ;;  %v1696_v21 = vadd.f32 %v1695_v47, %v1606_v19 }
 0x13a   : > { %v1612_v18 = vpop.f32.mrf.mxu0 }
 0x13b   : > { %v3794_v9 = vpop.f32.mrf.mxu1  ;;  %v1227_v51 = vadd.f32 %v1226_v2, %v1136_v43  ;;  %v1613_v23 = vadd.f32 %v1612_v18, %v1523_v20  ;;  %v1233_v2 = vadd.f32 %v4722_v27, %v1144_v60  ;;  %v5158_v20 = vld [vmem:[#allocation12_spill] sm:$0xff] }
 0x13c   : > { %v3761_v13 = vpop.f32.mrf.mxu0  ;;  %v5170_v60 = vld [vmem:[#allocation8_spill] sm:$0xff] }
 0x13d   : > { %v1871_v28 = vpop.f32.mrf.mxu1  ;;  %v1312_v25 = vadd.f32 %v4718_v17, %v1227_v51  ;;  %v1704_v26 = vadd.f32 %v1703_v63, %v1613_v23  ;;  %v1318_v16 = vadd.f32 %v4720_v42, %v1233_v2  ;;  %v5161_v51 = vld [vmem:[#allocation3_spill] sm:$0xff]  ;;  %v5166_v23 = vld [vmem:[#allocation13_spill] sm:$0xff] }
 0x13e   : > { %v1780_v8 = vpop.f32.mrf.mxu0 }
 0x13f   : > { %v1781_v31 = vadd.f32 %v1780_v8, %v1688_v22  ;;  %v3797_v48 = vpop.f32.mrf.mxu1 }
 0x140   : > { %v3781_v9 = vpop.f32.mrf.mxu0  ;;  %v5160_v48 = vld [vmem:[#allocation2_spill] sm:$0xff] }
 0x141   : > { %v1866_v35 = vadd.f32 %v1865_v14, %v1781_v31  ;;  %v1877_v30 = vpop.f32.mrf.mxu1  ;;  %v5159_v31 = vld [vmem:[#allocation14_spill] sm:$0xff]  ;;  %v5163_v9 = vld [vmem:[#allocation7_spill] sm:$0xff] }
 0x142   : > { %v1786_v36 = vpop.f32.mrf.mxu0 }
 0x143   : > { %v1881_v11 = vadd.f32 %v1866_v35, %v1306_v15  ;;  %v1787_v33 = vadd.f32 %v1786_v36, %v1696_v21  ;;  %v3800_v37 = vpop.f32.mrf.mxu1  ;;  %v5164_v15 = vld [vmem:[#allocation9_spill] sm:$0xff]  ;;  %v5165_v21 = vld [vmem:[#allocation11_spill] sm:$0xff]  ;;  %v5167_v35 = vld [vmem:[#allocation4_spill] sm:$0xff] }
 0x144   : > { %v3784_v34 = vpop.f32.mrf.mxu0  ;;  %v5169_v36 = vld [vmem:[#allocation6_spill] sm:$0xff]  ;;  %v5173_v37 = vld [vmem:[#allocation16_spill] sm:$0xff] }
 0x145   : > { %v4733_v46 = vadd.f32 %v1888_v54, %v1881_v11  ;;  %v1872_v24 = vadd.f32 %v1871_v28, %v1787_v33  ;;  %v5171_v11 = vld [vmem:[#allocation10_spill] sm:$0xff]  ;;  %v5172_v33 = vld [vmem:[#allocation15_spill] sm:$0xff] }
 0x146   : > { %v1792_v57 = vpop.f32.mrf.mxu0  ;;  %v5175_v34 = vld [vmem:[#allocation19_spill] sm:$0xff] }
 0x147   : > { %v1902_v14 = vsel %vm1900_vm2, %v4733_v46, 0  ;;  %v1882_v47 = vadd.f32 %v1872_v24, %v1312_v25  ;;  %v1793_v6 = vadd.f32 %v1792_v57, %v1704_v26  ;;  %v5174_v25 = vld [vmem:[#allocation18_spill] sm:$0xff] }
 0x148   : > { %v4737_v1 = vand.u32 4294901760, %v1902_v14  ;;  %v3787_v39 = vpop.f32.mrf.mxu0 }
 0x149   : > { %v4740_v17 = vadd.f32 %v1888_v54, %v1882_v47  ;;  %v1878_v53 = vadd.f32 %v1877_v30, %v1793_v6  ;;  %v5168_v30 = vld [vmem:[#allocation17_spill] sm:$0xff] }
 0x14a   : > { %v4743_v27 = vsub.f32 %v1902_v14, %v4737_v1  ;;  %3843 = vmatmul.mubr.f32.vlgmr.msra.gmra.mxu1 %v4737_v1 }
 0x14b   : > { %v1905_v63 = vsel %vm1900_vm2, %v4740_v17, 0  ;;  %v1883_v0 = vadd.f32 %v1878_v53, %v1318_v16  ;;  %3877 = vmatpush3.msra.mxu1 %v4544_v38  ;;  %3845 = vmatprep.mubr.msk.f32.mxu1 %vm4138_vm0, %v5157_v7 }
 0x14c   : > { %v1985_v58 = vand.u32 4294901760, %v4743_v27  ;;  %v4752_v42 = vand.u32 4294901760, %v1905_v63  ;;  %3878 = vmatprep.subr.mxu1 %v5157_v7 }
 0x14d   : > { %v4755_v18 = vadd.f32 %v1888_v54, %v1883_v0  ;;  %3879 = vmatpush3.msra.mxu1 %v4552_v41  ;;  %v5162_v54 = vld [vmem:[#allocation5_spill] sm:$0xff] }
 0x14e   : > { %v1986_v59 = vsub.f32 %v4743_v27, %v1985_v58  ;;  %v4760_v32 = vsub.f32 %v1905_v63, %v4752_v42  ;;  %3880 = vmatprep.subr.mxu1 %v5157_v7  ;;  %3846 = vmatmul.mubr.f32.gmra.mxu1 %v4752_v42 }
 0x14f   : > { %v1908_v13 = vsel %vm1900_vm2, %v4755_v18, 0  ;;  %3881 = vmatpush3.msra.mxu1 %v4565_v45  ;;  %3848 = vmatprep.mubr.msk.f32.mxu1 %vm4138_vm0, %v5157_v7 }
 0x150   : > { %v4769_v5 = vand.u32 4294901760, %v1908_v13  ;;  %3882 = vmatprep.subr.mxu1 %v5157_v7  ;;  %v1987_v52 = vand.u32 4294901760, %v1986_v59  ;;  %v1995_v12 = vand.u32 4294901760, %v4760_v32 }
 0x151   : > { %3883 = vmatpush3.msra.mxu1 %v4580_v50 }
 0x152   : > { %v4775_v22 = vsub.f32 %v1908_v13, %v4769_v5  ;;  %3884 = vmatprep.subr.mxu1 %v5157_v7  ;;  %3818 = vmatmul.mubr.f32.vlgmr.msra.gmra.mxu0 %v1987_v52  ;;  %v1996_v19 = vsub.f32 %v4760_v32, %v1995_v12 }
 0x153   : > { %3849 = vmatmul.mubr.f32.gmra.mxu1 %v4769_v5  ;;  %3852 = vmatpush3.msra.mxu0 %v4550_v40 }
 0x154   : > { %3885 = vmatpush3.msra.mxu1 %v4598_v56  ;;  %3853 = vmatprep.subr.mxu0 %v5157_v7  ;;  %v1997_v28 = vand.u32 4294901760, %v1996_v19  ;;  %v2005_v43 = vand.u32 4294901760, %v4775_v22 }
 0x155   : > { %3886 = vmatprep.subr.mxu1 %v5157_v7  ;;  %3854 = vmatpush3.msra.mxu0 %v4563_v44 }
 0x156   : > { %3887 = vmatpush3.msra.mxu1 %v4612_v61  ;;  %3820 = vmatprep.mubr.msk.f32.mxu0 %vm4138_vm0, %v5157_v7  ;;  %v2006_v8 = vsub.f32 %v4775_v22, %v2005_v43 }
 0x157   : > { %3855 = vmatprep.subr.mxu0 %v5157_v7  ;;  %3888 = vmatprep.subr.mxu1 %v5157_v7 }
 0x158   : > { %3821 = vmatmul.mubr.f32.gmra.mxu0 %v1997_v28  ;;  %3889 = vmatpush3.msra.mxu1 %v4630_v4  ;;  %v2007_v29 = vand.u32 4294901760, %v2006_v8 }
 0x159   : > { %3856 = vmatpush3.msra.mxu0 %v4578_v49  ;;  %3890 = vmatprep.subr.mxu1 %v5157_v7 }
 0x15a   : > { %3857 = vmatprep.subr.mxu0 %v5157_v7  ;;  %3891 = vmatpush3.msra.mxu1 %v4650_v10 }
 0x15b   : > { %3858 = vmatpush3.msra.mxu0 %v4595_v55  ;;  %3892 = vmatprep.mubr.msk.f32.mxu1 %vm4138_vm0, %v5157_v7 }
 0x15c   : > { %3823 = vmatprep.mubr.msk.f32.mxu0 %vm4138_vm0, %v5157_v7  ;;  %3859 = vmatprep.subr.mxu0 %v5157_v7 }
 0x15d   : > { %3893 = vmatmul.mubr.f32.vlgmr.msra.gmra.mxu1 %v1985_v58  ;;  %3926 = vmatprep.subr.mxu1 %v5157_v7 }
 0x15e   : > { %3824 = vmatmul.mubr.f32.gmra.mxu0 %v2007_v29  ;;  %3927 = vmatpush3.msra.mxu1 %v4544_v38 }
 0x15f   : > { %3860 = vmatpush3.msra.mxu0 %v4616_v62  ;;  %3928 = vmatprep.subr.mxu1 %v5157_v7 }
 0x160   : > { %3861 = vmatprep.subr.mxu0 %v5157_v7  ;;  %3895 = vmatprep.mubr.msk.f32.mxu1 %vm4138_vm0, %v5157_v7 }
 0x161   : > { %3862 = vmatpush3.msra.mxu0 %v4628_v3  ;;  %3929 = vmatpush3.msra.mxu1 %v4552_v41 }
 0x162   : > { %3863 = vmatprep.subr.mxu0 %v5157_v7  ;;  %3896 = vmatmul.mubr.f32.gmra.mxu1 %v1995_v12 }
 0x163   : > { %3930 = vmatprep.subr.mxu1 %v5157_v7  ;;  %3864 = vmatpush3.msra.mxu0 %v5158_v20 }
 0x164   : > { %3931 = vmatpush3.msra.mxu1 %v4565_v45  ;;  %3865 = vmatprep.subr.mxu0 %v5157_v7 }
 0x165   : > { %3932 = vmatprep.subr.mxu1 %v5157_v7  ;;  %3866 = vmatpush3.msra.mxu0 %v5159_v31 }
 0x166   : > { %3867 = vmatprep.mubr.msk.f32.mxu0 %vm4138_vm0, %v5157_v7  ;;  %3898 = vmatprep.mubr.msk.f32.mxu1 %vm4138_vm0, %v5157_v7 }
 0x167   : > { %3933 = vmatpush3.msra.mxu1 %v4580_v50  ;;  %3868 = vmatmul.mubr.f32.vlgmr.msra.gmra.mxu0 %v4743_v27 }
 0x168   : > { %3899 = vmatmul.mubr.f32.gmra.mxu1 %v2005_v43  ;;  %3901 = vmatprep.subr.mxu0 %v5157_v7 }
 0x169   : > { %3934 = vmatprep.subr.mxu1 %v5157_v7  ;;  %3902 = vmatpush3.msra.mxu0 %v5160_v48 }
 0x16a   : > { %3935 = vmatpush3.msra.mxu1 %v4598_v56  ;;  %3903 = vmatprep.subr.mxu0 %v5157_v7 }
 0x16b   : > { %3936 = vmatprep.subr.mxu1 %v5157_v7  ;;  %3870 = vmatprep.mubr.msk.f32.mxu0 %vm4138_vm0, %v5157_v7 }
 0x16c   : > { %3904 = vmatpush3.msra.mxu0 %v5161_v51  ;;  %3937 = vmatpush3.msra.mxu1 %v4612_v61 }
 0x16d   : > { %3871 = vmatmul.mubr.f32.gmra.mxu0 %v4760_v32  ;;  %3905 = vmatprep.subr.mxu0 %v5157_v7 }
 0x16e   : > { %3938 = vmatprep.subr.mxu1 %v5157_v7  ;;  %3906 = vmatpush3.msra.mxu0 %v5162_v54 }
 0x16f   : > { %3939 = vmatpush3.msra.mxu1 %v4630_v4  ;;  %3907 = vmatprep.subr.mxu0 %v5157_v7 }
 0x170   : > { %3940 = vmatprep.subr.mxu1 %v5157_v7  ;;  %3873 = vmatprep.mubr.msk.f32.mxu0 %vm4138_vm0, %v5157_v7 }
 0x171   : > { %3908 = vmatpush3.msra.mxu0 %v5163_v9  ;;  %3941 = vmatpush3.msra.mxu1 %v4650_v10 }
 0x172   : > { %3942 = vmatprep.mubr.msk.f32.mxu1 %vm4138_vm0, %v5157_v7  ;;  %3874 = vmatmul.mubr.f32.gmra.mxu0 %v4775_v22 }
 0x173   : > { %3909 = vmatprep.subr.mxu0 %v5157_v7  ;;  %3943 = vmatmul.mubr.f32.vlgmr.msra.gmra.mxu1 %v4737_v1 }
 0x174   : > { %3910 = vmatpush3.msra.mxu0 %v5164_v15  ;;  %3945 = vmatprep.mubr.msk.f32.mxu1 %vm4138_vm0, %v5157_v7 }
 0x175   : > { %3911 = vmatprep.subr.mxu0 %v5157_v7  ;;  %3917 = vmatprep.mubr.msk.f32.mxu0 %vm4138_vm0, %v5157_v7 }
 0x176   : > { %3912 = vmatpush3.msra.mxu0 %v5165_v21  ;;  %3976 = vmatprep.subr.mxu1 %v5157_v7 }
 0x177   : > { %3913 = vmatprep.subr.mxu0 %v5157_v7  ;;  %3946 = vmatmul.mubr.f32.gmra.mxu1 %v4752_v42 }
 0x178   : > { %3914 = vmatpush3.msra.mxu0 %v5166_v23  ;;  %3948 = vmatprep.mubr.msk.f32.mxu1 %vm4138_vm0, %v5157_v7 }
 0x179   : > { %3915 = vmatprep.subr.mxu0 %v5157_v7  ;;  %3977 = vmatpush3.msra.mxu1 %v5167_v35 }
 0x17a   : > { %3916 = vmatpush3.msra.mxu0 %v5168_v30  ;;  %3978 = vmatprep.subr.mxu1 %v5157_v7 }
 0x17b   : > { %3918 = vmatmul.mubr.f32.vlgmr.msra.gmra.mxu0 %v4737_v1  ;;  %3949 = vmatmul.mubr.f32.gmra.mxu1 %v4769_v5 }
 0x17c   : > { %3920 = vmatprep.mubr.msk.f32.mxu0 %vm4138_vm0, %v5157_v7  ;;  %3979 = vmatpush3.msra.mxu1 %v5169_v36 }
 0x17d   : > { %3980 = vmatprep.subr.mxu1 %v5157_v7  ;;  %3951 = vmatprep.subr.mxu0 %v5157_v7 }
 0x17e   : > { %3981 = vmatpush3.msra.mxu1 %v5170_v60  ;;  %3952 = vmatpush3.msra.mxu0 %v4544_v38 }
 0x17f   : > { %3921 = vmatmul.mubr.f32.gmra.mxu0 %v4752_v42  ;;  %3982 = vmatprep.subr.mxu1 %v5157_v7 }
 0x180   : > { %3923 = vmatprep.mubr.msk.f32.mxu0 %vm4138_vm0, %v5157_v7  ;;  %3983 = vmatpush3.msra.mxu1 %v5171_v11 }
 0x181   : > { %3984 = vmatprep.subr.mxu1 %v5157_v7  ;;  %3953 = vmatprep.subr.mxu0 %v5157_v7 }
 0x182   : > { %3985 = vmatpush3.msra.mxu1 %v5172_v33  ;;  %3954 = vmatpush3.msra.mxu0 %v4552_v41 }
 0x183   : > { %3924 = vmatmul.mubr.f32.gmra.mxu0 %v4769_v5  ;;  %3986 = vmatprep.subr.mxu1 %v5157_v7 }
 0x184   : > { %3987 = vmatpush3.msra.mxu1 %v5173_v37  ;;  %3955 = vmatprep.subr.mxu0 %v5157_v7 }
 0x185   : > { %3988 = vmatprep.subr.mxu1 %v5157_v7  ;;  %3956 = vmatpush3.msra.mxu0 %v4565_v45 }
 0x186   : > { %3989 = vmatpush3.msra.mxu1 %v5174_v25  ;;  %3957 = vmatprep.subr.mxu0 %v5157_v7 }
 0x187   : > { %3990 = vmatprep.subr.mxu1 %v5157_v7  ;;  %3958 = vmatpush3.msra.mxu0 %v4580_v50 }
 0x188   : > { %3991 = vmatpush3.msra.mxu1 %v5175_v34  ;;  %3959 = vmatprep.subr.mxu0 %v5157_v7 }
 0x189   : > { %3992 = vmatprep.mubr.msk.f32.mxu1 %vm4138_vm0, %v5157_v7  ;;  %4026 = vmatprep.subr.mxu1 %v5157_v7 }
 0x18a   : > { %3960 = vmatpush3.msra.mxu0 %v4598_v56  ;;  %3967 = vmatprep.mubr.msk.f32.mxu0 %vm4138_vm0, %v5157_v7 }
 0x18b   : > { %3961 = vmatprep.subr.mxu0 %v5157_v7 }
 0x18c   : > { %3962 = vmatpush3.msra.mxu0 %v4612_v61 }
 0x18d   : > { %3963 = vmatprep.subr.mxu0 %v5157_v7 }
 0x18e   : > { %3964 = vmatpush3.msra.mxu0 %v4630_v4 }
 0x18f   : > { %3965 = vmatprep.subr.mxu0 %v5157_v7 }
 0x190   : > { %3966 = vmatpush3.msra.mxu0 %v4650_v10 }
 0x191   : > { %4001 = vmatprep.subr.mxu0 %v5157_v7 }
 0x20a   : > { %v2120_v2 = vpop.f32.mrf.mxu1 }
 0x20c   : > { %v3844_v26 = vpop.f32.mrf.mxu1 }
 0x20e   : > { %v2126_v24 = vpop.f32.mrf.mxu1 }
 0x210   : > { %v3847_v57 = vpop.f32.mrf.mxu1 }
 0x212   : > { %v1989_v14 = vpop.f32.mrf.mxu0 }
 0x213   : > { %v2132_v47 = vpop.f32.mrf.mxu1  ;;  %v2121_v28 = vadd.f32 %v2120_v2, %v1989_v14 }
 0x214   : > { %v3819_v6 = vpop.f32.mrf.mxu0 }
 0x215   : > { %v3850_v1 = vpop.f32.mrf.mxu1 }
 0x218   : > { %v1999_v39 = vpop.f32.mrf.mxu0 }
 0x219   : > { %v2127_v36 = vadd.f32 %v2126_v24, %v1999_v39 }
 0x21a   : > { %v3822_v16 = vpop.f32.mrf.mxu0 }
 0x21d   : > { %v2315_v53 = vpop.f32.mrf.mxu1 }
 0x21e   : > { %v2009_v27 = vpop.f32.mrf.mxu0 }
 0x21f   : > { %v3894_v63 = vpop.f32.mrf.mxu1  ;;  %v2133_v34 = vadd.f32 %v2132_v47, %v2009_v27 }
 0x220   : > { %v3825_v0 = vpop.f32.mrf.mxu0 }
 0x222   : > { %v2323_v58 = vpop.f32.mrf.mxu1 }
 0x224   : > { %v3897_v42 = vpop.f32.mrf.mxu1 }
 0x227   : > { %v2220_v59 = vpop.f32.mrf.mxu0 }
 0x228   : > { %v2331_v32 = vpop.f32.mrf.mxu1  ;;  %v2221_v29 = vadd.f32 %v2220_v59, %v2121_v28 }
 0x229   : > { %v3869_v13 = vpop.f32.mrf.mxu0 }
 0x22a   : > { %v3900_v5 = vpop.f32.mrf.mxu1  ;;  %v2316_v33 = vadd.f32 %v2315_v53, %v2221_v29 }
 0x22d   : > { %v2227_v52 = vpop.f32.mrf.mxu0 }
 0x22e   : > { %v2228_v11 = vadd.f32 %v2227_v52, %v2127_v36 }
 0x22f   : > { %v3872_v12 = vpop.f32.mrf.mxu0 }
 0x230   : > { %v2324_v63 = vadd.f32 %v2323_v58, %v2228_v11 }
 0x232   : > { %v2234_v22 = vpop.f32.mrf.mxu0 }
 0x233   : > { %v2517_v19 = vpop.f32.mrf.mxu1  ;;  %v2235_v1 = vadd.f32 %v2234_v22, %v2133_v34 }
 0x234   : > { %v3875_v43 = vpop.f32.mrf.mxu0 }
 0x235   : > { %v3944_v8 = vpop.f32.mrf.mxu1  ;;  %v2332_v53 = vadd.f32 %v2331_v32, %v2235_v1 }
 0x237   : > { %v2523_v35 = vpop.f32.mrf.mxu1 }
 0x239   : > { %v3947_v60 = vpop.f32.mrf.mxu1 }
 0x23b   : > { %v2426_v37 = vpop.f32.mrf.mxu0  ;;  %v2529_v25 = vpop.f32.mrf.mxu1 }
 0x23c   : > { %v2427_v26 = vadd.f32 %v2426_v37, %v2316_v33 }
 0x23d   : > { %v3919_v57 = vpop.f32.mrf.mxu0  ;;  %v3950_v6 = vpop.f32.mrf.mxu1 }
 0x23e   : > { %v2518_v16 = vadd.f32 %v2517_v19, %v2427_v26 }
 0x23f   : > { %v2432_v0 = vpop.f32.mrf.mxu0 }
 0x240   : > { %v4912_v2 = vsub.f32 %v4733_v46, %v2518_v16  ;;  %v2433_v14 = vadd.f32 %v2432_v0, %v2324_v63 }
 0x241   : > { %v3922_v42 = vpop.f32.mrf.mxu0 }
 0x242   : > { %v2536_v24 = vmul.f32 %v4912_v2, %v4912_v2  ;;  %v2524_v39 = vadd.f32 %v2523_v35, %v2433_v14 }
 0x243   : > { %v2438_v59 = vpop.f32.mrf.mxu0 }
 0x244   : > { %v2540_v47 = vsel %vm1900_vm2, %v2536_v24, 0  ;;  %v4918_v27 = vsub.f32 %v4740_v17, %v2524_v39  ;;  %v2439_v13 = vadd.f32 %v2438_v59, %v2332_v53 }
 0x245   : > { %v4920_v5 = vand.u32 4294901760, %v2540_v47  ;;  %v3925_v58 = vpop.f32.mrf.mxu0 }
 0x246   : > { %v2537_v46 = vmul.f32 %v4918_v27, %v4918_v27  ;;  %v2530_v52 = vadd.f32 %v2529_v25, %v2439_v13 }
 0x247   : > { %v4925_v12 = vsub.f32 %v2540_v47, %v4920_v5  ;;  %3993 = vmatmul.mubr.f32.vlgmr.msra.gmra.mxu1 %v4920_v5 }
 0x248   : > { %v4929_v32 = vsub.f32 %v4755_v18, %v2530_v52  ;;  %4027 = vmatpush3.msra.mxu1 %v4544_v38  ;;  %3995 = vmatprep.mubr.msk.f32.mxu1 %vm4138_vm0, %v5157_v7  ;;  %v2543_v17 = vsel %vm1900_vm2, %v2537_v46, 0 }
 0x249   : > { %v2623_v22 = vand.u32 4294901760, %v4925_v12  ;;  %4028 = vmatprep.subr.mxu1 %v5157_v7  ;;  %v4937_v19 = vand.u32 4294901760, %v2543_v17 }
 0x24a   : > { %v2538_v28 = vmul.f32 %v4929_v32, %v4929_v32  ;;  %4029 = vmatpush3.msra.mxu1 %v4552_v41 }
 0x24b   : > { %4030 = vmatprep.subr.mxu1 %v5157_v7  ;;  %3996 = vmatmul.mubr.f32.gmra.mxu1 %v4937_v19  ;;  %v2624_v18 = vsub.f32 %v4925_v12, %v2623_v22  ;;  %v4946_v43 = vsub.f32 %v2543_v17, %v4937_v19 }
 0x24c   : > { %4031 = vmatpush3.msra.mxu1 %v4565_v45  ;;  %3998 = vmatprep.mubr.msk.f32.mxu1 %vm4138_vm0, %v5157_v7  ;;  %v2546_v8 = vsel %vm1900_vm2, %v2538_v28, 0 }
 0x24d   : > { %4032 = vmatprep.subr.mxu1 %v5157_v7  ;;  %v2625_v29 = vand.u32 4294901760, %v2624_v18  ;;  %v4953_v35 = vand.u32 4294901760, %v2546_v8  ;;  %v2633_v36 = vand.u32 4294901760, %v4946_v43 }
 0x24e   : > { %4033 = vmatpush3.msra.mxu1 %v4580_v50 }
 0x24f   : > { %4034 = vmatprep.subr.mxu1 %v5157_v7  ;;  %3968 = vmatmul.mubr.f32.vlgmr.msra.gmra.mxu0 %v2625_v29  ;;  %v2634_v60 = vsub.f32 %v4946_v43, %v2633_v36  ;;  %v4960_v11 = vsub.f32 %v2546_v8, %v4953_v35 }
 0x250   : > { %3999 = vmatmul.mubr.f32.gmra.mxu1 %v4953_v35  ;;  %4002 = vmatpush3.msra.mxu0 %v4550_v40 }
 0x251   : > { %4035 = vmatpush3.msra.mxu1 %v4598_v56  ;;  %4003 = vmatprep.subr.mxu0 %v5157_v7  ;;  %v2635_v33 = vand.u32 4294901760, %v2634_v60  ;;  %v2643_v37 = vand.u32 4294901760, %v4960_v11 }
 0x252   : > { %4036 = vmatprep.subr.mxu1 %v5157_v7  ;;  %4004 = vmatpush3.msra.mxu0 %v4563_v44 }
 0x253   : > { %4037 = vmatpush3.msra.mxu1 %v4612_v61  ;;  %3970 = vmatprep.mubr.msk.f32.mxu0 %vm4138_vm0, %v5157_v7  ;;  %v2644_v25 = vsub.f32 %v4960_v11, %v2643_v37 }
 0x254   : > { %4005 = vmatprep.subr.mxu0 %v5157_v7  ;;  %4038 = vmatprep.subr.mxu1 %v5157_v7 }
 0x255   : > { %3971 = vmatmul.mubr.f32.gmra.mxu0 %v2635_v33  ;;  %4039 = vmatpush3.msra.mxu1 %v4630_v4  ;;  %v2645_v40 = vand.u32 4294901760, %v2644_v25  ;;  %v5177_v25 = vld [vmem:[#allocation21_spill] sm:$0xff] }
 0x256   : > { %4006 = vmatpush3.msra.mxu0 %v4578_v49  ;;  %4040 = vmatprep.subr.mxu1 %v5157_v7 }
 0x257   : > { %4007 = vmatprep.subr.mxu0 %v5157_v7  ;;  %4041 = vmatpush3.msra.mxu1 %v4650_v10 }
 0x258   : > { %4008 = vmatpush3.msra.mxu0 %v4595_v55  ;;  %4042 = vmatprep.mubr.msk.f32.mxu1 %vm4138_vm0, %v5157_v7 }
 0x259   : > { %3973 = vmatprep.mubr.msk.f32.mxu0 %vm4138_vm0, %v5157_v7  ;;  %4009 = vmatprep.subr.mxu0 %v5157_v7 }
 0x25a   : > { %4043 = vmatmul.mubr.f32.vlgmr.msra.gmra.mxu1 %v2623_v22  ;;  %4076 = vmatprep.subr.mxu1 %v5157_v7 }
 0x25b   : > { %3974 = vmatmul.mubr.f32.gmra.mxu0 %v2645_v40  ;;  %4077 = vmatpush3.msra.mxu1 %v4544_v38 }
 0x25c   : > { %4010 = vmatpush3.msra.mxu0 %v4616_v62  ;;  %4078 = vmatprep.subr.mxu1 %v5157_v7 }
 0x25d   : > { %4011 = vmatprep.subr.mxu0 %v5157_v7  ;;  %4045 = vmatprep.mubr.msk.f32.mxu1 %vm4138_vm0, %v5157_v7 }
 0x25e   : > { %4012 = vmatpush3.msra.mxu0 %v4628_v3  ;;  %4079 = vmatpush3.msra.mxu1 %v4552_v41 }
 0x25f   : > { %4013 = vmatprep.subr.mxu0 %v5157_v7  ;;  %4046 = vmatmul.mubr.f32.gmra.mxu1 %v2633_v36 }
 0x260   : > { %4080 = vmatprep.subr.mxu1 %v5157_v7  ;;  %4014 = vmatpush3.msra.mxu0 %v5158_v20 }
 0x261   : > { %4081 = vmatpush3.msra.mxu1 %v4565_v45  ;;  %4015 = vmatprep.subr.mxu0 %v5157_v7 }
 0x262   : > { %4082 = vmatprep.subr.mxu1 %v5157_v7  ;;  %4016 = vmatpush3.msra.mxu0 %v5159_v31 }
 0x263   : > { %4017 = vmatprep.mubr.msk.f32.mxu0 %vm4138_vm0, %v5157_v7  ;;  %4048 = vmatprep.mubr.msk.f32.mxu1 %vm4138_vm0, %v5157_v7 }
 0x264   : > { %4083 = vmatpush3.msra.mxu1 %v4580_v50  ;;  %4018 = vmatmul.mubr.f32.vlgmr.msra.gmra.mxu0 %v4925_v12 }
 0x265   : > { %4049 = vmatmul.mubr.f32.gmra.mxu1 %v2643_v37  ;;  %4051 = vmatprep.subr.mxu0 %v5157_v7 }
 0x266   : > { %4084 = vmatprep.subr.mxu1 %v5157_v7  ;;  %4052 = vmatpush3.msra.mxu0 %v5160_v48 }
 0x267   : > { %4085 = vmatpush3.msra.mxu1 %v4598_v56  ;;  %4053 = vmatprep.subr.mxu0 %v5157_v7 }
 0x268   : > { %4086 = vmatprep.subr.mxu1 %v5157_v7  ;;  %4020 = vmatprep.mubr.msk.f32.mxu0 %vm4138_vm0, %v5157_v7 }
 0x269   : > { %4054 = vmatpush3.msra.mxu0 %v5161_v51  ;;  %4087 = vmatpush3.msra.mxu1 %v4612_v61 }
 0x26a   : > { %4021 = vmatmul.mubr.f32.gmra.mxu0 %v4946_v43  ;;  %4055 = vmatprep.subr.mxu0 %v5157_v7 }
 0x26b   : > { %4088 = vmatprep.subr.mxu1 %v5157_v7  ;;  %4056 = vmatpush3.msra.mxu0 %v5162_v54 }
 0x26c   : > { %4089 = vmatpush3.msra.mxu1 %v4630_v4  ;;  %4057 = vmatprep.subr.mxu0 %v5157_v7 }
 0x26d   : > { %4090 = vmatprep.subr.mxu1 %v5157_v7  ;;  %4023 = vmatprep.mubr.msk.f32.mxu0 %vm4138_vm0, %v5157_v7 }
 0x26e   : > { %4058 = vmatpush3.msra.mxu0 %v5163_v9  ;;  %4091 = vmatpush3.msra.mxu1 %v4650_v10 }
 0x26f   : > { %4092 = vmatprep.mubr.msk.f32.mxu1 %vm4138_vm0, %v5157_v7  ;;  %4024 = vmatmul.mubr.f32.gmra.mxu0 %v4960_v11  ;;  %v5176_v11 = vld [vmem:[#allocation20_spill] sm:$0xff] }
 0x270   : > { %4059 = vmatprep.subr.mxu0 %v5157_v7  ;;  %4093 = vmatmul.mubr.f32.vlgmr.msra.gmra.mxu1 %v4920_v5 }
 0x271   : > { %4060 = vmatpush3.msra.mxu0 %v5164_v15  ;;  %4095 = vmatprep.mubr.msk.f32.mxu1 %vm4138_vm0, %v5157_v7 }
 0x272   : > { %4061 = vmatprep.subr.mxu0 %v5157_v7  ;;  %4067 = vmatprep.mubr.msk.f32.mxu0 %vm4138_vm0, %v5157_v7 }
 0x273   : > { %4062 = vmatpush3.msra.mxu0 %v5165_v21 }
 0x274   : > { %4063 = vmatprep.subr.mxu0 %v5157_v7  ;;  %4096 = vmatmul.mubr.f32.gmra.mxu1 %v4937_v19 }
 0x275   : > { %4064 = vmatpush3.msra.mxu0 %v5166_v23  ;;  %4098 = vmatprep.mubr.msk.f32.mxu1 %vm4138_vm0, %v5157_v7 }
 0x276   : > { %4065 = vmatprep.subr.mxu0 %v5157_v7 }
 0x277   : > { %4066 = vmatpush3.msra.mxu0 %v5168_v30 }
 0x278   : > { %4068 = vmatmul.mubr.f32.vlgmr.msra.gmra.mxu0 %v4920_v5  ;;  %4099 = vmatmul.mubr.f32.gmra.mxu1 %v4953_v35 }
 0x279   : > { %4070 = vmatprep.mubr.msk.f32.mxu0 %vm4138_vm0, %v5157_v7 }
 0x27c   : > { %4071 = vmatmul.mubr.f32.gmra.mxu0 %v4937_v19 }
 0x27d   : > { %4073 = vmatprep.mubr.msk.f32.mxu0 %vm4138_vm0, %v5157_v7 }
 0x280   : > { %4074 = vmatmul.mubr.f32.gmra.mxu0 %v4953_v35 }
 0x307   : > { %v2758_v38 = vpop.f32.mrf.mxu1 }
 0x309   : > { %v3994_v41 = vpop.f32.mrf.mxu1 }
 0x30b   : > { %v2764_v44 = vpop.f32.mrf.mxu1 }
 0x30d   : > { %v3997_v45 = vpop.f32.mrf.mxu1 }
 0x30f   : > { %v2627_v49 = vpop.f32.mrf.mxu0 }
 0x310   : > { %v2770_v50 = vpop.f32.mrf.mxu1  ;;  %v2628_v23 = vadd.f32 1e-05, %v2627_v49 }
 0x311   : > { %v3969_v55 = vpop.f32.mrf.mxu0 }
 0x312   : > { %v4000_v56 = vpop.f32.mrf.mxu1  ;;  %v2759_v57 = vadd.f32 %v2758_v38, %v2628_v23 }
 0x315   : > { %v2637_v61 = vpop.f32.mrf.mxu0 }
 0x316   : > { %v2638_v26 = vadd.f32 1e-05, %v2637_v61 }
 0x317   : > { %v3972_v62 = vpop.f32.mrf.mxu0 }
 0x318   : > { %v2765_v14 = vadd.f32 %v2764_v44, %v2638_v26 }
 0x31a   : > { %v2953_v3 = vpop.f32.mrf.mxu1 }
 0x31b   : > { %v2647_v4 = vpop.f32.mrf.mxu0 }
 0x31c   : > { %v4044_v10 = vpop.f32.mrf.mxu1  ;;  %v2648_v0 = vadd.f32 1e-05, %v2647_v4 }
 0x31d   : > { %v3975_v20 = vpop.f32.mrf.mxu0 }
 0x31e   : > { %v2771_v47 = vadd.f32 %v2770_v50, %v2648_v0 }
 0x31f   : > { %v2961_v31 = vpop.f32.mrf.mxu1 }
 0x321   : > { %v4047_v48 = vpop.f32.mrf.mxu1 }
 0x324   : > { %v2858_v51 = vpop.f32.mrf.mxu0 }
 0x325   : > { %v2969_v7 = vpop.f32.mrf.mxu1  ;;  %v2859_v16 = vadd.f32 %v2858_v51, %v2759_v57 }
 0x326   : > { %v4019_v54 = vpop.f32.mrf.mxu0 }
 0x327   : > { %v4050_v9 = vpop.f32.mrf.mxu1  ;;  %v2954_v39 = vadd.f32 %v2953_v3, %v2859_v16 }
 0x32a   : > { %v2865_v15 = vpop.f32.mrf.mxu0 }
 0x32b   : > { %v2866_v24 = vadd.f32 %v2865_v15, %v2765_v14 }
 0x32c   : > { %v4022_v21 = vpop.f32.mrf.mxu0 }
 0x32d   : > { %v2962_v12 = vadd.f32 %v2961_v31, %v2866_v24 }
 0x32f   : > { %v2872_v30 = vpop.f32.mrf.mxu0 }
 0x330   : > { %v3155_v34 = vpop.f32.mrf.mxu1  ;;  %v2873_v46 = vadd.f32 %v2872_v30, %v2771_v47 }
 0x331   : > { %v4025_v6 = vpop.f32.mrf.mxu0 }
 0x332   : > { %v4094_v1 = vpop.f32.mrf.mxu1  ;;  %v2970_v18 = vadd.f32 %v2969_v7, %v2873_v46 }
 0x334   : > { %v3161_v63 = vpop.f32.mrf.mxu1 }
 0x336   : > { %v4097_v42 = vpop.f32.mrf.mxu1 }
 0x338   : > { %v3064_v53 = vpop.f32.mrf.mxu0  ;;  %v3167_v59 = vpop.f32.mrf.mxu1 }
 0x339   : > { %v3065_v13 = vadd.f32 %v3064_v53, %v2954_v39 }
 0x33a   : > { %v4069_v5 = vpop.f32.mrf.mxu0  ;;  %v4100_v58 = vpop.f32.mrf.mxu1 }
 0x33b   : > { %v3156_v52 = vadd.f32 %v3155_v34, %v3065_v13 }
 0x33c   : > { %v3070_v17 = vpop.f32.mrf.mxu0 }
 0x33d   : > { %4111 = vrsqrt.f32 %v3156_v52  ;;  %v3071_v22 = vadd.f32 %v3070_v17, %v2962_v12 }
 0x33e   : > { %v4072_v19 = vpop.f32.mrf.mxu0 }
 0x33f   : > { %v3162_v28 = vadd.f32 %v3161_v63, %v3071_v22 }
 0x340   : > { %v3076_v43 = vpop.f32.mrf.mxu0 }
 0x341   : > { %4113 = vrsqrt.f32 %v3162_v28  ;;  %v3077_v8 = vadd.f32 %v3076_v43, %v2970_v18 }
 0x342   : > { %v4075_v29 = vpop.f32.mrf.mxu0 }
 0x343   : > { %v3168_v35 = vadd.f32 %v3167_v59, %v3077_v8 }
 0x345   : > { %4115 = vrsqrt.f32 %v3168_v35 }
 0x34a   : > { %v4112_v36 = vpop.eup %4111 }
 0x34b   : > { %v3174_v60 = vmul.f32 %v4112_v36, %v4912_v2 }
 0x34d   : > { %v3181_v33 = vmul.f32 %v5176_v11, %v3174_v60 }
 0x34e   : > { %v4114_v37 = vpop.eup %4113 }
 0x34f   : > { %v5059_v40 = vadd.f32 %v5177_v25, %v3181_v33  ;;  %v3175_v38 = vmul.f32 %v4114_v37, %v4918_v27 }
 0x351   : > { %v5063_v41 = vmul.f32 0.70710677, %v5059_v40  ;;  %v3182_v44 = vmul.f32 %v5176_v11, %v3175_v38 }
 0x352   : > { %v4116_v45 = vpop.eup %4115 }
 0x353   : > { %v3194_v49 = vand.u32 2147483647, %v5063_v41  ;;  %v5068_v50 = vadd.f32 %v5177_v25, %v3182_v44  ;;  %v3176_v2 = vmul.f32 %v4116_v45, %v4929_v32  ;;  %vm3254_vm3 = vcmp.ge.f32.partialorder %v5063_v41, 0.0 }
 0x354   : > { %v3263_v45 = vmul.f32 0.5, %v5059_v40 }
 0x355   : > { %v3197_v55 = vmul.f32 0.3275911, %v3194_v49  ;;  %v5072_v56 = vmul.f32 0.70710677, %v5068_v50  ;;  %v3183_v61 = vmul.f32 %v5176_v11, %v3176_v2  ;;  %v3236_v48 = vsub.f32 0.0, %v3194_v49 }
 0x356   : > { %v3264_v41 = vmul.f32 0.5, %v5068_v50 }
 0x357   : > { %v3200_v27 = vadd.f32 1.0, %v3197_v55  ;;  %v3195_v62 = vand.u32 2147483647, %v5072_v56  ;;  %v5077_v3 = vadd.f32 %v5177_v25, %v3183_v61  ;;  %v3239_v7 = vmul.f32 %v3236_v48, %v3194_v49 }
 0x358   : > { %vm3255_vm4 = vcmp.ge.f32.partialorder %v5072_v56, 0.0 }
 0x359   : > { %4117 = vrcp.f32 %v3200_v27  ;;  %v3198_v4 = vmul.f32 0.3275911, %v3195_v62  ;;  %v5080_v10 = vmul.f32 0.70710677, %v5077_v3  ;;  %v3237_v54 = vsub.f32 0.0, %v3195_v62 }
 0x35a   : > { %v3242_v21 = vmul.f32 1.442695, %v3239_v7 }
 0x35b   : > { %v3201_v20 = vadd.f32 1.0, %v3198_v4  ;;  %v3196_v32 = vand.u32 2147483647, %v5080_v10  ;;  %v3240_v23 = vmul.f32 %v3237_v54, %v3195_v62  ;;  %vm3256_vm5 = vcmp.ge.f32.partialorder %v5080_v10, 0.0 }
 0x35d   : > { %4119 = vrcp.f32 %v3201_v20  ;;  %v3199_v31 = vmul.f32 0.3275911, %v3196_v32  ;;  %v3238_v30 = vsub.f32 0.0, %v3196_v32  ;;  %v3244_v1 = vmul.f32 1.442695, %v3240_v23 }
 0x35f   : > { %v3202_v51 = vadd.f32 1.0, %v3199_v31  ;;  %v3241_v16 = vmul.f32 %v3238_v30, %v3196_v32 }
 0x361   : > { %4121 = vrcp.f32 %v3202_v51  ;;  %v3246_v53 = vmul.f32 1.442695, %v3241_v16  ;;  %v3265_v51 = vmul.f32 0.5, %v5077_v3 }
 0x362   : > { %4123 = vpow2.f32 %v3242_v21 }
 0x363   : > { %4125 = vpow2.f32 %v3244_v1 }
 0x364   : > { %4127 = vpow2.f32 %v3246_v53 }
 0x366   : > { %v4118_v9 = vpop.eup %4117 }
 0x367   : > { %v3209_v15 = vmul.f32 1.0614054, %v4118_v9 }
 0x369   : > { %v3212_v34 = vadd.f32 -1.4531521, %v3209_v15 }
 0x36a   : > { %v4120_v26 = vpop.eup %4119 }
 0x36b   : > { %v3215_v57 = vmul.f32 %v4118_v9, %v3212_v34  ;;  %v3210_v6 = vmul.f32 1.0614054, %v4120_v26 }
 0x36d   : > { %v3218_v63 = vadd.f32 1.4214138, %v3215_v57  ;;  %v3213_v0 = vadd.f32 -1.4531521, %v3210_v6 }
 0x36e   : > { %v4122_v14 = vpop.eup %4121 }
 0x36f   : > { %v3221_v42 = vmul.f32 %v4118_v9, %v3218_v63  ;;  %v3216_v24 = vmul.f32 %v4120_v26, %v3213_v0  ;;  %v3211_v39 = vmul.f32 1.0614054, %v4122_v14  ;;  %v4124_v28 = vpop.eup %4123 }
 0x370   : > { %v4126_v60 = vpop.eup %4125 }
 0x371   : > { %v3224_v59 = vadd.f32 -0.28449672, %v3221_v42  ;;  %v3219_v47 = vadd.f32 1.4214138, %v3216_v24  ;;  %v3214_v13 = vadd.f32 -1.4531521, %v3211_v39  ;;  %v4128_v55 = vpop.eup %4127 }
 0x373   : > { %v3227_v5 = vmul.f32 %v4118_v9, %v3224_v59  ;;  %v3222_v58 = vmul.f32 %v4120_v26, %v3219_v47  ;;  %v3217_v46 = vmul.f32 %v4122_v14, %v3214_v13 }
 0x375   : > { %v3230_v52 = vadd.f32 0.2548296, %v3227_v5  ;;  %v3225_v12 = vadd.f32 -0.28449672, %v3222_v58  ;;  %v3220_v17 = vadd.f32 1.4214138, %v3217_v46 }
 0x377   : > { %v3233_v22 = vmul.f32 %v4118_v9, %v3230_v52  ;;  %v3228_v19 = vmul.f32 %v4120_v26, %v3225_v12  ;;  %v3223_v18 = vmul.f32 %v4122_v14, %v3220_v17 }
 0x379   : > { %v3248_v43 = vmul.f32 %v4124_v28, %v3233_v22  ;;  %v3231_v8 = vadd.f32 0.2548296, %v3228_v19  ;;  %v3226_v29 = vadd.f32 -0.28449672, %v3223_v18 }
 0x37b   : > { %v3251_v35 = vsub.f32 1.0, %v3248_v43  ;;  %v3234_v36 = vmul.f32 %v4120_v26, %v3231_v8  ;;  %v3229_v11 = vmul.f32 %v4122_v14, %v3226_v29 }
 0x37d   : > { %v3257_v33 = vsub.f32 0.0, %v3251_v35  ;;  %v3249_v37 = vmul.f32 %v4126_v60, %v3234_v36  ;;  %v3232_v25 = vadd.f32 0.2548296, %v3229_v11 }
 0x37f   : > { %v3260_v38 = vsel %vm3254_vm3, %v3251_v35, %v3257_v33  ;;  %v3252_v44 = vsub.f32 1.0, %v3249_v37  ;;  %v3235_v2 = vmul.f32 %v4122_v14, %v3232_v25 }
 0x380   : > { %v3266_v49 = vadd.f32 1.0, %v3260_v38 }
 0x381   : > { %v3258_v61 = vsub.f32 0.0, %v3252_v44  ;;  %v3250_v62 = vmul.f32 %v4128_v55, %v3235_v2 }
 0x382   : > { %v3269_v27 = vmul.f32 %v3266_v49, %v3263_v45 }
 0x383   : > { %v3261_v4 = vsel %vm3255_vm4, %v3252_v44, %v3258_v61  ;;  %v3253_v32 = vsub.f32 1.0, %v3250_v62 }
 0x384   : > { %3272 = vst.msk [vmem:[%s199_s5] sm:$0xff] %vm1900_vm2, %v3269_v27  ;;  %v3267_v20 = vadd.f32 1.0, %v3261_v4 }
 0x385   : > { %v3259_v31 = vsub.f32 0.0, %v3253_v32 }
 0x386   : > { %v3270_v40 = vmul.f32 %v3267_v20, %v3264_v41 }
 0x387   : > { %v3262_v48 = vsel %vm3256_vm5, %v3253_v32, %v3259_v31 }
 0x388   : > { %3273 = vst.msk [vmem:[%s199_s5 + $0x8] sm:$0xff] %vm1900_vm2, %v3270_v40  ;;  %v3268_v7 = vadd.f32 1.0, %v3262_v48 }
 0x38a   : > { %v3271_v54 = vmul.f32 %v3268_v7, %v3265_v51 }
 0x38c   : > { %3274 = vst.msk [vmem:[%s199_s5 + $0x10] sm:$0xff] %vm1900_vm2, %v3271_v54 }
 0x38d PF: > { %s14_s15 = sadd.s32 1, %s4135_s15  }
 0x38e   : > { %p11_p5 = scmp.ge.s32.totalorder %s14_s15, 4  }
 0x390   :  { %13 = sbr.rel (!%p11_p5) target bundleno = 1 (0x1), region = 68 }

</bundles_post_ra>
